<compile_context>
chip_gen: v6e
topology: v6e:2x2x1
jax: 0.10.0
libtpu: 0.0.40
codegen_flags: <defaults>
</compile_context>

<pallas_src>
import jax
import jax.numpy as jnp
from jax.experimental import pallas as pl
from jax.experimental.pallas import tpu as pltpu

LANE = 128              # TPU lane width: last dim of every dense tile
DEF_BLOCK_ROWS = 2048   # batch rows per grid step (= SUBL * LANE, SUBL = 16)

F_IN, F_H1, F_H2, F_OUT = 8, 6, 4, 1


def _dense_vpu(rows, w_ref, b_ref, fan_in, fan_out, activation=None):
    """out[j] = act(b[j] + sum_i w[i, j] * rows[i]) as pure VPU broadcast-MACs.

    `rows` is a list of `fan_in` dense (SUBL, LANE) tiles (batch on sublanes+lanes);
    weights/biases are scalars read from SMEM, so each term is a scalar-broadcast
    multiply-add on full vregs (no MXU, no padded matmuls).
    """
    outs = []
    for j in range(fan_out):
        acc = rows[0] * w_ref[0, j]
        for i in range(1, fan_in):
            acc = acc + rows[i] * w_ref[i, j]
        acc = acc + b_ref[j]                       # bias added once per output row
        if activation is not None:
            acc = activation(acc)                  # logistic -> EUP slot (free here)
        outs.append(acc)
    return outs


def mlp_kernel(x_ref, w1_ref, b1_ref, w2_ref, b2_ref, w3_ref, b3_ref, o_ref):
    # x_ref: (8, SUBL, LANE) VMEM block of x^T; o_ref: (SUBL, LANE) VMEM block.
    x_rows = [x_ref[i] for i in range(F_IN)]       # 8 dense (SUBL, LANE) tiles
    h1 = _dense_vpu(x_rows, w1_ref, b1_ref, F_IN, F_H1, jax.nn.sigmoid)
    h2 = _dense_vpu(h1, w2_ref, b2_ref, F_H1, F_H2, jax.nn.sigmoid)
    y = _dense_vpu(h2, w3_ref, b3_ref, F_H2, F_OUT, None)[0]
    o_ref[...] = y


def mlp_forward(x, w1, b1, w2, b2, w3, b3, *, block_rows=DEF_BLOCK_ROWS):
    """x: (N, 8) float32 -> (N, 1) float32, same math as the PyTorch module."""
    n, f_in = x.shape
    assert f_in == F_IN
    assert block_rows % LANE == 0
    subl = block_rows // LANE

    # Pad batch to a whole number of blocks, then lay it out transposed as
    # (features, batch/LANE, LANE) so batch is lane-dense. Wrapper-side layout
    # plumbing only; the kernel never touches a lane-sparse tensor.
    n_pad = ((n + block_rows - 1) // block_rows) * block_rows
    xp = jnp.pad(x.astype(jnp.float32), ((0, n_pad - n), (0, 0)))
    xt = xp.T.reshape(F_IN, n_pad // LANE, LANE)

    smem = pl.BlockSpec(memory_space=pltpu.MemorySpace.SMEM)  # tiny params as scalars
    out = pl.pallas_call(
        mlp_kernel,
        out_shape=jax.ShapeDtypeStruct((n_pad // LANE, LANE), jnp.float32),
        grid=(n_pad // block_rows,),
        in_specs=[
            pl.BlockSpec((F_IN, subl, LANE), lambda i: (0, i, 0)),  # x^T batch blocks
            smem, smem,                                             # w1, b1
            smem, smem,                                             # w2, b2
            smem, smem,                                             # w3, b3
        ],
        out_specs=pl.BlockSpec((subl, LANE), lambda i: (i, 0)),
        compiler_params=pltpu.CompilerParams(
            dimension_semantics=("parallel",),   # v7x: shard batch over both TCs
        ),
    )(xt, w1, b1, w2, b2, w3, b3)

    return out.reshape(n_pad, 1)[:n]


def init_params(key):
    # Deterministic init mimicking PyTorch Linear's U(-1/sqrt(fan_in), 1/sqrt(fan_in)).
    keys = jax.random.split(key, 6)

    def lin(kw, kb, fan_in, fan_out):
        bound = 1.0 / jnp.sqrt(fan_in)
        # stored as (in, out) so the math is x @ W; biases kept 1-D for SMEM.
        w = jax.random.uniform(kw, (fan_in, fan_out), jnp.float32, -bound, bound)
        b = jax.random.uniform(kb, (fan_out,), jnp.float32, -bound, bound)
        return w, b

    w1, b1 = lin(keys[0], keys[1], F_IN, F_H1)
    w2, b2 = lin(keys[2], keys[3], F_H1, F_H2)
    w3, b3 = lin(keys[4], keys[5], F_H2, F_OUT)
    return w1, b1, w2, b2, w3, b3


if __name__ == "__main__":
    key = jax.random.PRNGKey(0)
    k_x, k_p = jax.random.split(key)
    batch = 3000  # not a multiple of the 2048-row block -> exercises padding + 2-step grid
    x = jax.random.normal(k_x, (batch, F_IN), jnp.float32)
    w1, b1, w2, b2, w3, b3 = init_params(k_p)

    out = mlp_forward(x, w1, b1, w2, b2, w3, b3)
    out = jax.block_until_ready(out)

    # Pure-JAX reference check
    ref = jax.nn.sigmoid(x @ w1 + b1)
    ref = jax.nn.sigmoid(ref @ w2 + b2)
    ref = ref @ w3 + b3
    ref = ref.reshape(batch, 1)
    assert out.shape == (batch, 1)
    assert jnp.allclose(out, ref, atol=1e-5, rtol=1e-5), "mismatch vs reference"
    print("KERNEL_OK")
</pallas_src>

<mosaic_0001>
module attributes {stable_mosaic.version = 11 : i64} {
  func.func @mlp_kernel(%arg0: i32, %arg1: memref<8x16x128xf32, #tpu.memory_space<vmem>>, %arg2: memref<8x6xf32, #tpu.memory_space<smem>>, %arg3: memref<6xf32, #tpu.memory_space<smem>>, %arg4: memref<6x4xf32, #tpu.memory_space<smem>>, %arg5: memref<4xf32, #tpu.memory_space<smem>>, %arg6: memref<4x1xf32, #tpu.memory_space<smem>>, %arg7: memref<1xf32, #tpu.memory_space<smem>>, %arg8: memref<16x128xf32, #tpu.memory_space<vmem>>) attributes {dimension_semantics = [#tpu.dimension_semantics<parallel>], iteration_bounds = array<i64: 2>, scalar_prefetch = 0 : i64, scratch_operands = 0 : i64, tpu.core_type = #tpu.core_type<tc>, window_params = [{transform_indices = @transform_0, window_bounds = array<i64: 8, 16, 128>}, {transform_indices = @transform_1, window_bounds = array<i64: 8, 6>}, {transform_indices = @transform_2, window_bounds = array<i64: 6>}, {transform_indices = @transform_3, window_bounds = array<i64: 6, 4>}, {transform_indices = @transform_4, window_bounds = array<i64: 4>}, {transform_indices = @transform_5, window_bounds = array<i64: 4, 1>}, {transform_indices = @transform_6, window_bounds = array<i64: 1>}, {transform_indices = @transform_7, window_bounds = array<i64: 16, 128>}]} {
    %c0 = arith.constant 0 : index
    %c0_0 = arith.constant 0 : index
    %c0_1 = arith.constant 0 : index
    %0 = vector.load %arg1[%c0, %c0_0, %c0_1] : memref<8x16x128xf32, #tpu.memory_space<vmem>>, vector<1x16x128xf32>
    %1 = vector.shape_cast %0 : vector<1x16x128xf32> to vector<16x128xf32>
    %c1 = arith.constant 1 : index
    %c0_2 = arith.constant 0 : index
    %c0_3 = arith.constant 0 : index
    %2 = vector.load %arg1[%c1, %c0_2, %c0_3] : memref<8x16x128xf32, #tpu.memory_space<vmem>>, vector<1x16x128xf32>
    %3 = vector.shape_cast %2 : vector<1x16x128xf32> to vector<16x128xf32>
    %c2 = arith.constant 2 : index
    %c0_4 = arith.constant 0 : index
    %c0_5 = arith.constant 0 : index
    %4 = vector.load %arg1[%c2, %c0_4, %c0_5] : memref<8x16x128xf32, #tpu.memory_space<vmem>>, vector<1x16x128xf32>
    %5 = vector.shape_cast %4 : vector<1x16x128xf32> to vector<16x128xf32>
    %c3 = arith.constant 3 : index
    %c0_6 = arith.constant 0 : index
    %c0_7 = arith.constant 0 : index
    %6 = vector.load %arg1[%c3, %c0_6, %c0_7] : memref<8x16x128xf32, #tpu.memory_space<vmem>>, vector<1x16x128xf32>
    %7 = vector.shape_cast %6 : vector<1x16x128xf32> to vector<16x128xf32>
    %c4 = arith.constant 4 : index
    %c0_8 = arith.constant 0 : index
    %c0_9 = arith.constant 0 : index
    %8 = vector.load %arg1[%c4, %c0_8, %c0_9] : memref<8x16x128xf32, #tpu.memory_space<vmem>>, vector<1x16x128xf32>
    %9 = vector.shape_cast %8 : vector<1x16x128xf32> to vector<16x128xf32>
    %c5 = arith.constant 5 : index
    %c0_10 = arith.constant 0 : index
    %c0_11 = arith.constant 0 : index
    %10 = vector.load %arg1[%c5, %c0_10, %c0_11] : memref<8x16x128xf32, #tpu.memory_space<vmem>>, vector<1x16x128xf32>
    %11 = vector.shape_cast %10 : vector<1x16x128xf32> to vector<16x128xf32>
    %c6 = arith.constant 6 : index
    %c0_12 = arith.constant 0 : index
    %c0_13 = arith.constant 0 : index
    %12 = vector.load %arg1[%c6, %c0_12, %c0_13] : memref<8x16x128xf32, #tpu.memory_space<vmem>>, vector<1x16x128xf32>
    %13 = vector.shape_cast %12 : vector<1x16x128xf32> to vector<16x128xf32>
    %c7 = arith.constant 7 : index
    %c0_14 = arith.constant 0 : index
    %c0_15 = arith.constant 0 : index
    %14 = vector.load %arg1[%c7, %c0_14, %c0_15] : memref<8x16x128xf32, #tpu.memory_space<vmem>>, vector<1x16x128xf32>
    %15 = vector.shape_cast %14 : vector<1x16x128xf32> to vector<16x128xf32>
    %c0_16 = arith.constant 0 : index
    %c0_17 = arith.constant 0 : index
    %16 = memref.load %arg2[%c0_16, %c0_17] : memref<8x6xf32, #tpu.memory_space<smem>>
    %17 = vector.broadcast %16 : f32 to vector<16x128xf32>
    %18 = arith.mulf %1, %17 : vector<16x128xf32>
    %c1_18 = arith.constant 1 : index
    %c0_19 = arith.constant 0 : index
    %19 = memref.load %arg2[%c1_18, %c0_19] : memref<8x6xf32, #tpu.memory_space<smem>>
    %20 = vector.broadcast %19 : f32 to vector<16x128xf32>
    %21 = arith.mulf %3, %20 : vector<16x128xf32>
    %22 = arith.addf %18, %21 : vector<16x128xf32>
    %c2_20 = arith.constant 2 : index
    %c0_21 = arith.constant 0 : index
    %23 = memref.load %arg2[%c2_20, %c0_21] : memref<8x6xf32, #tpu.memory_space<smem>>
    %24 = vector.broadcast %23 : f32 to vector<16x128xf32>
    %25 = arith.mulf %5, %24 : vector<16x128xf32>
    %26 = arith.addf %22, %25 : vector<16x128xf32>
    %c3_22 = arith.constant 3 : index
    %c0_23 = arith.constant 0 : index
    %27 = memref.load %arg2[%c3_22, %c0_23] : memref<8x6xf32, #tpu.memory_space<smem>>
    %28 = vector.broadcast %27 : f32 to vector<16x128xf32>
    %29 = arith.mulf %7, %28 : vector<16x128xf32>
    %30 = arith.addf %26, %29 : vector<16x128xf32>
    %c4_24 = arith.constant 4 : index
    %c0_25 = arith.constant 0 : index
    %31 = memref.load %arg2[%c4_24, %c0_25] : memref<8x6xf32, #tpu.memory_space<smem>>
    %32 = vector.broadcast %31 : f32 to vector<16x128xf32>
    %33 = arith.mulf %9, %32 : vector<16x128xf32>
    %34 = arith.addf %30, %33 : vector<16x128xf32>
    %c5_26 = arith.constant 5 : index
    %c0_27 = arith.constant 0 : index
    %35 = memref.load %arg2[%c5_26, %c0_27] : memref<8x6xf32, #tpu.memory_space<smem>>
    %36 = vector.broadcast %35 : f32 to vector<16x128xf32>
    %37 = arith.mulf %11, %36 : vector<16x128xf32>
    %38 = arith.addf %34, %37 : vector<16x128xf32>
    %c6_28 = arith.constant 6 : index
    %c0_29 = arith.constant 0 : index
    %39 = memref.load %arg2[%c6_28, %c0_29] : memref<8x6xf32, #tpu.memory_space<smem>>
    %40 = vector.broadcast %39 : f32 to vector<16x128xf32>
    %41 = arith.mulf %13, %40 : vector<16x128xf32>
    %42 = arith.addf %38, %41 : vector<16x128xf32>
    %c7_30 = arith.constant 7 : index
    %c0_31 = arith.constant 0 : index
    %43 = memref.load %arg2[%c7_30, %c0_31] : memref<8x6xf32, #tpu.memory_space<smem>>
    %44 = vector.broadcast %43 : f32 to vector<16x128xf32>
    %45 = arith.mulf %15, %44 : vector<16x128xf32>
    %46 = arith.addf %42, %45 : vector<16x128xf32>
    %c0_32 = arith.constant 0 : index
    %47 = memref.load %arg3[%c0_32] : memref<6xf32, #tpu.memory_space<smem>>
    %48 = vector.broadcast %47 : f32 to vector<16x128xf32>
    %49 = arith.addf %46, %48 : vector<16x128xf32>
    %50 = arith.negf %49 : vector<16x128xf32>
    %51 = math.exp %50 : vector<16x128xf32>
    %cst = arith.constant 1.000000e+00 : f32
    %52 = vector.broadcast %cst : f32 to vector<16x128xf32>
    %53 = arith.addf %52, %51 : vector<16x128xf32>
    %54 = arith.divf %52, %53 : vector<16x128xf32>
    %c0_33 = arith.constant 0 : index
    %c1_34 = arith.constant 1 : index
    %55 = memref.load %arg2[%c0_33, %c1_34] : memref<8x6xf32, #tpu.memory_space<smem>>
    %56 = vector.broadcast %55 : f32 to vector<16x128xf32>
    %57 = arith.mulf %1, %56 : vector<16x128xf32>
    %c1_35 = arith.constant 1 : index
    %c1_36 = arith.constant 1 : index
    %58 = memref.load %arg2[%c1_35, %c1_36] : memref<8x6xf32, #tpu.memory_space<smem>>
    %59 = vector.broadcast %58 : f32 to vector<16x128xf32>
    %60 = arith.mulf %3, %59 : vector<16x128xf32>
    %61 = arith.addf %57, %60 : vector<16x128xf32>
    %c2_37 = arith.constant 2 : index
    %c1_38 = arith.constant 1 : index
    %62 = memref.load %arg2[%c2_37, %c1_38] : memref<8x6xf32, #tpu.memory_space<smem>>
    %63 = vector.broadcast %62 : f32 to vector<16x128xf32>
    %64 = arith.mulf %5, %63 : vector<16x128xf32>
    %65 = arith.addf %61, %64 : vector<16x128xf32>
    %c3_39 = arith.constant 3 : index
    %c1_40 = arith.constant 1 : index
    %66 = memref.load %arg2[%c3_39, %c1_40] : memref<8x6xf32, #tpu.memory_space<smem>>
    %67 = vector.broadcast %66 : f32 to vector<16x128xf32>
    %68 = arith.mulf %7, %67 : vector<16x128xf32>
    %69 = arith.addf %65, %68 : vector<16x128xf32>
    %c4_41 = arith.constant 4 : index
    %c1_42 = arith.constant 1 : index
    %70 = memref.load %arg2[%c4_41, %c1_42] : memref<8x6xf32, #tpu.memory_space<smem>>
    %71 = vector.broadcast %70 : f32 to vector<16x128xf32>
    %72 = arith.mulf %9, %71 : vector<16x128xf32>
    %73 = arith.addf %69, %72 : vector<16x128xf32>
    %c5_43 = arith.constant 5 : index
    %c1_44 = arith.constant 1 : index
    %74 = memref.load %arg2[%c5_43, %c1_44] : memref<8x6xf32, #tpu.memory_space<smem>>
    %75 = vector.broadcast %74 : f32 to vector<16x128xf32>
    %76 = arith.mulf %11, %75 : vector<16x128xf32>
    %77 = arith.addf %73, %76 : vector<16x128xf32>
    %c6_45 = arith.constant 6 : index
    %c1_46 = arith.constant 1 : index
    %78 = memref.load %arg2[%c6_45, %c1_46] : memref<8x6xf32, #tpu.memory_space<smem>>
    %79 = vector.broadcast %78 : f32 to vector<16x128xf32>
    %80 = arith.mulf %13, %79 : vector<16x128xf32>
    %81 = arith.addf %77, %80 : vector<16x128xf32>
    %c7_47 = arith.constant 7 : index
    %c1_48 = arith.constant 1 : index
    %82 = memref.load %arg2[%c7_47, %c1_48] : memref<8x6xf32, #tpu.memory_space<smem>>
    %83 = vector.broadcast %82 : f32 to vector<16x128xf32>
    %84 = arith.mulf %15, %83 : vector<16x128xf32>
    %85 = arith.addf %81, %84 : vector<16x128xf32>
    %c1_49 = arith.constant 1 : index
    %86 = memref.load %arg3[%c1_49] : memref<6xf32, #tpu.memory_space<smem>>
    %87 = vector.broadcast %86 : f32 to vector<16x128xf32>
    %88 = arith.addf %85, %87 : vector<16x128xf32>
    %89 = arith.negf %88 : vector<16x128xf32>
    %90 = math.exp %89 : vector<16x128xf32>
    %cst_50 = arith.constant 1.000000e+00 : f32
    %91 = vector.broadcast %cst_50 : f32 to vector<16x128xf32>
    %92 = arith.addf %91, %90 : vector<16x128xf32>
    %93 = arith.divf %91, %92 : vector<16x128xf32>
    %c0_51 = arith.constant 0 : index
    %c2_52 = arith.constant 2 : index
    %94 = memref.load %arg2[%c0_51, %c2_52] : memref<8x6xf32, #tpu.memory_space<smem>>
    %95 = vector.broadcast %94 : f32 to vector<16x128xf32>
    %96 = arith.mulf %1, %95 : vector<16x128xf32>
    %c1_53 = arith.constant 1 : index
    %c2_54 = arith.constant 2 : index
    %97 = memref.load %arg2[%c1_53, %c2_54] : memref<8x6xf32, #tpu.memory_space<smem>>
    %98 = vector.broadcast %97 : f32 to vector<16x128xf32>
    %99 = arith.mulf %3, %98 : vector<16x128xf32>
    %100 = arith.addf %96, %99 : vector<16x128xf32>
    %c2_55 = arith.constant 2 : index
    %c2_56 = arith.constant 2 : index
    %101 = memref.load %arg2[%c2_55, %c2_56] : memref<8x6xf32, #tpu.memory_space<smem>>
    %102 = vector.broadcast %101 : f32 to vector<16x128xf32>
    %103 = arith.mulf %5, %102 : vector<16x128xf32>
    %104 = arith.addf %100, %103 : vector<16x128xf32>
    %c3_57 = arith.constant 3 : index
    %c2_58 = arith.constant 2 : index
    %105 = memref.load %arg2[%c3_57, %c2_58] : memref<8x6xf32, #tpu.memory_space<smem>>
    %106 = vector.broadcast %105 : f32 to vector<16x128xf32>
    %107 = arith.mulf %7, %106 : vector<16x128xf32>
    %108 = arith.addf %104, %107 : vector<16x128xf32>
    %c4_59 = arith.constant 4 : index
    %c2_60 = arith.constant 2 : index
    %109 = memref.load %arg2[%c4_59, %c2_60] : memref<8x6xf32, #tpu.memory_space<smem>>
    %110 = vector.broadcast %109 : f32 to vector<16x128xf32>
    %111 = arith.mulf %9, %110 : vector<16x128xf32>
    %112 = arith.addf %108, %111 : vector<16x128xf32>
    %c5_61 = arith.constant 5 : index
    %c2_62 = arith.constant 2 : index
    %113 = memref.load %arg2[%c5_61, %c2_62] : memref<8x6xf32, #tpu.memory_space<smem>>
    %114 = vector.broadcast %113 : f32 to vector<16x128xf32>
    %115 = arith.mulf %11, %114 : vector<16x128xf32>
    %116 = arith.addf %112, %115 : vector<16x128xf32>
    %c6_63 = arith.constant 6 : index
    %c2_64 = arith.constant 2 : index
    %117 = memref.load %arg2[%c6_63, %c2_64] : memref<8x6xf32, #tpu.memory_space<smem>>
    %118 = vector.broadcast %117 : f32 to vector<16x128xf32>
    %119 = arith.mulf %13, %118 : vector<16x128xf32>
    %120 = arith.addf %116, %119 : vector<16x128xf32>
    %c7_65 = arith.constant 7 : index
    %c2_66 = arith.constant 2 : index
    %121 = memref.load %arg2[%c7_65, %c2_66] : memref<8x6xf32, #tpu.memory_space<smem>>
    %122 = vector.broadcast %121 : f32 to vector<16x128xf32>
    %123 = arith.mulf %15, %122 : vector<16x128xf32>
    %124 = arith.addf %120, %123 : vector<16x128xf32>
    %c2_67 = arith.constant 2 : index
    %125 = memref.load %arg3[%c2_67] : memref<6xf32, #tpu.memory_space<smem>>
    %126 = vector.broadcast %125 : f32 to vector<16x128xf32>
    %127 = arith.addf %124, %126 : vector<16x128xf32>
    %128 = arith.negf %127 : vector<16x128xf32>
    %129 = math.exp %128 : vector<16x128xf32>
    %cst_68 = arith.constant 1.000000e+00 : f32
    %130 = vector.broadcast %cst_68 : f32 to vector<16x128xf32>
    %131 = arith.addf %130, %129 : vector<16x128xf32>
    %132 = arith.divf %130, %131 : vector<16x128xf32>
    %c0_69 = arith.constant 0 : index
    %c3_70 = arith.constant 3 : index
    %133 = memref.load %arg2[%c0_69, %c3_70] : memref<8x6xf32, #tpu.memory_space<smem>>
    %134 = vector.broadcast %133 : f32 to vector<16x128xf32>
    %135 = arith.mulf %1, %134 : vector<16x128xf32>
    %c1_71 = arith.constant 1 : index
    %c3_72 = arith.constant 3 : index
    %136 = memref.load %arg2[%c1_71, %c3_72] : memref<8x6xf32, #tpu.memory_space<smem>>
    %137 = vector.broadcast %136 : f32 to vector<16x128xf32>
    %138 = arith.mulf %3, %137 : vector<16x128xf32>
    %139 = arith.addf %135, %138 : vector<16x128xf32>
    %c2_73 = arith.constant 2 : index
    %c3_74 = arith.constant 3 : index
    %140 = memref.load %arg2[%c2_73, %c3_74] : memref<8x6xf32, #tpu.memory_space<smem>>
    %141 = vector.broadcast %140 : f32 to vector<16x128xf32>
    %142 = arith.mulf %5, %141 : vector<16x128xf32>
    %143 = arith.addf %139, %142 : vector<16x128xf32>
    %c3_75 = arith.constant 3 : index
    %c3_76 = arith.constant 3 : index
    %144 = memref.load %arg2[%c3_75, %c3_76] : memref<8x6xf32, #tpu.memory_space<smem>>
    %145 = vector.broadcast %144 : f32 to vector<16x128xf32>
    %146 = arith.mulf %7, %145 : vector<16x128xf32>
    %147 = arith.addf %143, %146 : vector<16x128xf32>
    %c4_77 = arith.constant 4 : index
    %c3_78 = arith.constant 3 : index
    %148 = memref.load %arg2[%c4_77, %c3_78] : memref<8x6xf32, #tpu.memory_space<smem>>
    %149 = vector.broadcast %148 : f32 to vector<16x128xf32>
    %150 = arith.mulf %9, %149 : vector<16x128xf32>
    %151 = arith.addf %147, %150 : vector<16x128xf32>
    %c5_79 = arith.constant 5 : index
    %c3_80 = arith.constant 3 : index
    %152 = memref.load %arg2[%c5_79, %c3_80] : memref<8x6xf32, #tpu.memory_space<smem>>
    %153 = vector.broadcast %152 : f32 to vector<16x128xf32>
    %154 = arith.mulf %11, %153 : vector<16x128xf32>
    %155 = arith.addf %151, %154 : vector<16x128xf32>
    %c6_81 = arith.constant 6 : index
    %c3_82 = arith.constant 3 : index
    %156 = memref.load %arg2[%c6_81, %c3_82] : memref<8x6xf32, #tpu.memory_space<smem>>
    %157 = vector.broadcast %156 : f32 to vector<16x128xf32>
    %158 = arith.mulf %13, %157 : vector<16x128xf32>
    %159 = arith.addf %155, %158 : vector<16x128xf32>
    %c7_83 = arith.constant 7 : index
    %c3_84 = arith.constant 3 : index
    %160 = memref.load %arg2[%c7_83, %c3_84] : memref<8x6xf32, #tpu.memory_space<smem>>
    %161 = vector.broadcast %160 : f32 to vector<16x128xf32>
    %162 = arith.mulf %15, %161 : vector<16x128xf32>
    %163 = arith.addf %159, %162 : vector<16x128xf32>
    %c3_85 = arith.constant 3 : index
    %164 = memref.load %arg3[%c3_85] : memref<6xf32, #tpu.memory_space<smem>>
    %165 = vector.broadcast %164 : f32 to vector<16x128xf32>
    %166 = arith.addf %163, %165 : vector<16x128xf32>
    %167 = arith.negf %166 : vector<16x128xf32>
    %168 = math.exp %167 : vector<16x128xf32>
    %cst_86 = arith.constant 1.000000e+00 : f32
    %169 = vector.broadcast %cst_86 : f32 to vector<16x128xf32>
    %170 = arith.addf %169, %168 : vector<16x128xf32>
    %171 = arith.divf %169, %170 : vector<16x128xf32>
    %c0_87 = arith.constant 0 : index
    %c4_88 = arith.constant 4 : index
    %172 = memref.load %arg2[%c0_87, %c4_88] : memref<8x6xf32, #tpu.memory_space<smem>>
    %173 = vector.broadcast %172 : f32 to vector<16x128xf32>
    %174 = arith.mulf %1, %173 : vector<16x128xf32>
    %c1_89 = arith.constant 1 : index
    %c4_90 = arith.constant 4 : index
    %175 = memref.load %arg2[%c1_89, %c4_90] : memref<8x6xf32, #tpu.memory_space<smem>>
    %176 = vector.broadcast %175 : f32 to vector<16x128xf32>
    %177 = arith.mulf %3, %176 : vector<16x128xf32>
    %178 = arith.addf %174, %177 : vector<16x128xf32>
    %c2_91 = arith.constant 2 : index
    %c4_92 = arith.constant 4 : index
    %179 = memref.load %arg2[%c2_91, %c4_92] : memref<8x6xf32, #tpu.memory_space<smem>>
    %180 = vector.broadcast %179 : f32 to vector<16x128xf32>
    %181 = arith.mulf %5, %180 : vector<16x128xf32>
    %182 = arith.addf %178, %181 : vector<16x128xf32>
    %c3_93 = arith.constant 3 : index
    %c4_94 = arith.constant 4 : index
    %183 = memref.load %arg2[%c3_93, %c4_94] : memref<8x6xf32, #tpu.memory_space<smem>>
    %184 = vector.broadcast %183 : f32 to vector<16x128xf32>
    %185 = arith.mulf %7, %184 : vector<16x128xf32>
    %186 = arith.addf %182, %185 : vector<16x128xf32>
    %c4_95 = arith.constant 4 : index
    %c4_96 = arith.constant 4 : index
    %187 = memref.load %arg2[%c4_95, %c4_96] : memref<8x6xf32, #tpu.memory_space<smem>>
    %188 = vector.broadcast %187 : f32 to vector<16x128xf32>
    %189 = arith.mulf %9, %188 : vector<16x128xf32>
    %190 = arith.addf %186, %189 : vector<16x128xf32>
    %c5_97 = arith.constant 5 : index
    %c4_98 = arith.constant 4 : index
    %191 = memref.load %arg2[%c5_97, %c4_98] : memref<8x6xf32, #tpu.memory_space<smem>>
    %192 = vector.broadcast %191 : f32 to vector<16x128xf32>
    %193 = arith.mulf %11, %192 : vector<16x128xf32>
    %194 = arith.addf %190, %193 : vector<16x128xf32>
    %c6_99 = arith.constant 6 : index
    %c4_100 = arith.constant 4 : index
    %195 = memref.load %arg2[%c6_99, %c4_100] : memref<8x6xf32, #tpu.memory_space<smem>>
    %196 = vector.broadcast %195 : f32 to vector<16x128xf32>
    %197 = arith.mulf %13, %196 : vector<16x128xf32>
    %198 = arith.addf %194, %197 : vector<16x128xf32>
    %c7_101 = arith.constant 7 : index
    %c4_102 = arith.constant 4 : index
    %199 = memref.load %arg2[%c7_101, %c4_102] : memref<8x6xf32, #tpu.memory_space<smem>>
    %200 = vector.broadcast %199 : f32 to vector<16x128xf32>
    %201 = arith.mulf %15, %200 : vector<16x128xf32>
    %202 = arith.addf %198, %201 : vector<16x128xf32>
    %c4_103 = arith.constant 4 : index
    %203 = memref.load %arg3[%c4_103] : memref<6xf32, #tpu.memory_space<smem>>
    %204 = vector.broadcast %203 : f32 to vector<16x128xf32>
    %205 = arith.addf %202, %204 : vector<16x128xf32>
    %206 = arith.negf %205 : vector<16x128xf32>
    %207 = math.exp %206 : vector<16x128xf32>
    %cst_104 = arith.constant 1.000000e+00 : f32
    %208 = vector.broadcast %cst_104 : f32 to vector<16x128xf32>
    %209 = arith.addf %208, %207 : vector<16x128xf32>
    %210 = arith.divf %208, %209 : vector<16x128xf32>
    %c0_105 = arith.constant 0 : index
    %c5_106 = arith.constant 5 : index
    %211 = memref.load %arg2[%c0_105, %c5_106] : memref<8x6xf32, #tpu.memory_space<smem>>
    %212 = vector.broadcast %211 : f32 to vector<16x128xf32>
    %213 = arith.mulf %1, %212 : vector<16x128xf32>
    %c1_107 = arith.constant 1 : index
    %c5_108 = arith.constant 5 : index
    %214 = memref.load %arg2[%c1_107, %c5_108] : memref<8x6xf32, #tpu.memory_space<smem>>
    %215 = vector.broadcast %214 : f32 to vector<16x128xf32>
    %216 = arith.mulf %3, %215 : vector<16x128xf32>
    %217 = arith.addf %213, %216 : vector<16x128xf32>
    %c2_109 = arith.constant 2 : index
    %c5_110 = arith.constant 5 : index
    %218 = memref.load %arg2[%c2_109, %c5_110] : memref<8x6xf32, #tpu.memory_space<smem>>
    %219 = vector.broadcast %218 : f32 to vector<16x128xf32>
    %220 = arith.mulf %5, %219 : vector<16x128xf32>
    %221 = arith.addf %217, %220 : vector<16x128xf32>
    %c3_111 = arith.constant 3 : index
    %c5_112 = arith.constant 5 : index
    %222 = memref.load %arg2[%c3_111, %c5_112] : memref<8x6xf32, #tpu.memory_space<smem>>
    %223 = vector.broadcast %222 : f32 to vector<16x128xf32>
    %224 = arith.mulf %7, %223 : vector<16x128xf32>
    %225 = arith.addf %221, %224 : vector<16x128xf32>
    %c4_113 = arith.constant 4 : index
    %c5_114 = arith.constant 5 : index
    %226 = memref.load %arg2[%c4_113, %c5_114] : memref<8x6xf32, #tpu.memory_space<smem>>
    %227 = vector.broadcast %226 : f32 to vector<16x128xf32>
    %228 = arith.mulf %9, %227 : vector<16x128xf32>
    %229 = arith.addf %225, %228 : vector<16x128xf32>
    %c5_115 = arith.constant 5 : index
    %c5_116 = arith.constant 5 : index
    %230 = memref.load %arg2[%c5_115, %c5_116] : memref<8x6xf32, #tpu.memory_space<smem>>
    %231 = vector.broadcast %230 : f32 to vector<16x128xf32>
    %232 = arith.mulf %11, %231 : vector<16x128xf32>
    %233 = arith.addf %229, %232 : vector<16x128xf32>
    %c6_117 = arith.constant 6 : index
    %c5_118 = arith.constant 5 : index
    %234 = memref.load %arg2[%c6_117, %c5_118] : memref<8x6xf32, #tpu.memory_space<smem>>
    %235 = vector.broadcast %234 : f32 to vector<16x128xf32>
    %236 = arith.mulf %13, %235 : vector<16x128xf32>
    %237 = arith.addf %233, %236 : vector<16x128xf32>
    %c7_119 = arith.constant 7 : index
    %c5_120 = arith.constant 5 : index
    %238 = memref.load %arg2[%c7_119, %c5_120] : memref<8x6xf32, #tpu.memory_space<smem>>
    %239 = vector.broadcast %238 : f32 to vector<16x128xf32>
    %240 = arith.mulf %15, %239 : vector<16x128xf32>
    %241 = arith.addf %237, %240 : vector<16x128xf32>
    %c5_121 = arith.constant 5 : index
    %242 = memref.load %arg3[%c5_121] : memref<6xf32, #tpu.memory_space<smem>>
    %243 = vector.broadcast %242 : f32 to vector<16x128xf32>
    %244 = arith.addf %241, %243 : vector<16x128xf32>
    %245 = arith.negf %244 : vector<16x128xf32>
    %246 = math.exp %245 : vector<16x128xf32>
    %cst_122 = arith.constant 1.000000e+00 : f32
    %247 = vector.broadcast %cst_122 : f32 to vector<16x128xf32>
    %248 = arith.addf %247, %246 : vector<16x128xf32>
    %249 = arith.divf %247, %248 : vector<16x128xf32>
    %c0_123 = arith.constant 0 : index
    %c0_124 = arith.constant 0 : index
    %250 = memref.load %arg4[%c0_123, %c0_124] : memref<6x4xf32, #tpu.memory_space<smem>>
    %251 = vector.broadcast %250 : f32 to vector<16x128xf32>
    %252 = arith.mulf %54, %251 : vector<16x128xf32>
    %c1_125 = arith.constant 1 : index
    %c0_126 = arith.constant 0 : index
    %253 = memref.load %arg4[%c1_125, %c0_126] : memref<6x4xf32, #tpu.memory_space<smem>>
    %254 = vector.broadcast %253 : f32 to vector<16x128xf32>
    %255 = arith.mulf %93, %254 : vector<16x128xf32>
    %256 = arith.addf %252, %255 : vector<16x128xf32>
    %c2_127 = arith.constant 2 : index
    %c0_128 = arith.constant 0 : index
    %257 = memref.load %arg4[%c2_127, %c0_128] : memref<6x4xf32, #tpu.memory_space<smem>>
    %258 = vector.broadcast %257 : f32 to vector<16x128xf32>
    %259 = arith.mulf %132, %258 : vector<16x128xf32>
    %260 = arith.addf %256, %259 : vector<16x128xf32>
    %c3_129 = arith.constant 3 : index
    %c0_130 = arith.constant 0 : index
    %261 = memref.load %arg4[%c3_129, %c0_130] : memref<6x4xf32, #tpu.memory_space<smem>>
    %262 = vector.broadcast %261 : f32 to vector<16x128xf32>
    %263 = arith.mulf %171, %262 : vector<16x128xf32>
    %264 = arith.addf %260, %263 : vector<16x128xf32>
    %c4_131 = arith.constant 4 : index
    %c0_132 = arith.constant 0 : index
    %265 = memref.load %arg4[%c4_131, %c0_132] : memref<6x4xf32, #tpu.memory_space<smem>>
    %266 = vector.broadcast %265 : f32 to vector<16x128xf32>
    %267 = arith.mulf %210, %266 : vector<16x128xf32>
    %268 = arith.addf %264, %267 : vector<16x128xf32>
    %c5_133 = arith.constant 5 : index
    %c0_134 = arith.constant 0 : index
    %269 = memref.load %arg4[%c5_133, %c0_134] : memref<6x4xf32, #tpu.memory_space<smem>>
    %270 = vector.broadcast %269 : f32 to vector<16x128xf32>
    %271 = arith.mulf %249, %270 : vector<16x128xf32>
    %272 = arith.addf %268, %271 : vector<16x128xf32>
    %c0_135 = arith.constant 0 : index
    %273 = memref.load %arg5[%c0_135] : memref<4xf32, #tpu.memory_space<smem>>
    %274 = vector.broadcast %273 : f32 to vector<16x128xf32>
    %275 = arith.addf %272, %274 : vector<16x128xf32>
    %276 = arith.negf %275 : vector<16x128xf32>
    %277 = math.exp %276 : vector<16x128xf32>
    %cst_136 = arith.constant 1.000000e+00 : f32
    %278 = vector.broadcast %cst_136 : f32 to vector<16x128xf32>
    %279 = arith.addf %278, %277 : vector<16x128xf32>
    %280 = arith.divf %278, %279 : vector<16x128xf32>
    %c0_137 = arith.constant 0 : index
    %c1_138 = arith.constant 1 : index
    %281 = memref.load %arg4[%c0_137, %c1_138] : memref<6x4xf32, #tpu.memory_space<smem>>
    %282 = vector.broadcast %281 : f32 to vector<16x128xf32>
    %283 = arith.mulf %54, %282 : vector<16x128xf32>
    %c1_139 = arith.constant 1 : index
    %c1_140 = arith.constant 1 : index
    %284 = memref.load %arg4[%c1_139, %c1_140] : memref<6x4xf32, #tpu.memory_space<smem>>
    %285 = vector.broadcast %284 : f32 to vector<16x128xf32>
    %286 = arith.mulf %93, %285 : vector<16x128xf32>
    %287 = arith.addf %283, %286 : vector<16x128xf32>
    %c2_141 = arith.constant 2 : index
    %c1_142 = arith.constant 1 : index
    %288 = memref.load %arg4[%c2_141, %c1_142] : memref<6x4xf32, #tpu.memory_space<smem>>
    %289 = vector.broadcast %288 : f32 to vector<16x128xf32>
    %290 = arith.mulf %132, %289 : vector<16x128xf32>
    %291 = arith.addf %287, %290 : vector<16x128xf32>
    %c3_143 = arith.constant 3 : index
    %c1_144 = arith.constant 1 : index
    %292 = memref.load %arg4[%c3_143, %c1_144] : memref<6x4xf32, #tpu.memory_space<smem>>
    %293 = vector.broadcast %292 : f32 to vector<16x128xf32>
    %294 = arith.mulf %171, %293 : vector<16x128xf32>
    %295 = arith.addf %291, %294 : vector<16x128xf32>
    %c4_145 = arith.constant 4 : index
    %c1_146 = arith.constant 1 : index
    %296 = memref.load %arg4[%c4_145, %c1_146] : memref<6x4xf32, #tpu.memory_space<smem>>
    %297 = vector.broadcast %296 : f32 to vector<16x128xf32>
    %298 = arith.mulf %210, %297 : vector<16x128xf32>
    %299 = arith.addf %295, %298 : vector<16x128xf32>
    %c5_147 = arith.constant 5 : index
    %c1_148 = arith.constant 1 : index
    %300 = memref.load %arg4[%c5_147, %c1_148] : memref<6x4xf32, #tpu.memory_space<smem>>
    %301 = vector.broadcast %300 : f32 to vector<16x128xf32>
    %302 = arith.mulf %249, %301 : vector<16x128xf32>
    %303 = arith.addf %299, %302 : vector<16x128xf32>
    %c1_149 = arith.constant 1 : index
    %304 = memref.load %arg5[%c1_149] : memref<4xf32, #tpu.memory_space<smem>>
    %305 = vector.broadcast %304 : f32 to vector<16x128xf32>
    %306 = arith.addf %303, %305 : vector<16x128xf32>
    %307 = arith.negf %306 : vector<16x128xf32>
    %308 = math.exp %307 : vector<16x128xf32>
    %cst_150 = arith.constant 1.000000e+00 : f32
    %309 = vector.broadcast %cst_150 : f32 to vector<16x128xf32>
    %310 = arith.addf %309, %308 : vector<16x128xf32>
    %311 = arith.divf %309, %310 : vector<16x128xf32>
    %c0_151 = arith.constant 0 : index
    %c2_152 = arith.constant 2 : index
    %312 = memref.load %arg4[%c0_151, %c2_152] : memref<6x4xf32, #tpu.memory_space<smem>>
    %313 = vector.broadcast %312 : f32 to vector<16x128xf32>
    %314 = arith.mulf %54, %313 : vector<16x128xf32>
    %c1_153 = arith.constant 1 : index
    %c2_154 = arith.constant 2 : index
    %315 = memref.load %arg4[%c1_153, %c2_154] : memref<6x4xf32, #tpu.memory_space<smem>>
    %316 = vector.broadcast %315 : f32 to vector<16x128xf32>
    %317 = arith.mulf %93, %316 : vector<16x128xf32>
    %318 = arith.addf %314, %317 : vector<16x128xf32>
    %c2_155 = arith.constant 2 : index
    %c2_156 = arith.constant 2 : index
    %319 = memref.load %arg4[%c2_155, %c2_156] : memref<6x4xf32, #tpu.memory_space<smem>>
    %320 = vector.broadcast %319 : f32 to vector<16x128xf32>
    %321 = arith.mulf %132, %320 : vector<16x128xf32>
    %322 = arith.addf %318, %321 : vector<16x128xf32>
    %c3_157 = arith.constant 3 : index
    %c2_158 = arith.constant 2 : index
    %323 = memref.load %arg4[%c3_157, %c2_158] : memref<6x4xf32, #tpu.memory_space<smem>>
    %324 = vector.broadcast %323 : f32 to vector<16x128xf32>
    %325 = arith.mulf %171, %324 : vector<16x128xf32>
    %326 = arith.addf %322, %325 : vector<16x128xf32>
    %c4_159 = arith.constant 4 : index
    %c2_160 = arith.constant 2 : index
    %327 = memref.load %arg4[%c4_159, %c2_160] : memref<6x4xf32, #tpu.memory_space<smem>>
    %328 = vector.broadcast %327 : f32 to vector<16x128xf32>
    %329 = arith.mulf %210, %328 : vector<16x128xf32>
    %330 = arith.addf %326, %329 : vector<16x128xf32>
    %c5_161 = arith.constant 5 : index
    %c2_162 = arith.constant 2 : index
    %331 = memref.load %arg4[%c5_161, %c2_162] : memref<6x4xf32, #tpu.memory_space<smem>>
    %332 = vector.broadcast %331 : f32 to vector<16x128xf32>
    %333 = arith.mulf %249, %332 : vector<16x128xf32>
    %334 = arith.addf %330, %333 : vector<16x128xf32>
    %c2_163 = arith.constant 2 : index
    %335 = memref.load %arg5[%c2_163] : memref<4xf32, #tpu.memory_space<smem>>
    %336 = vector.broadcast %335 : f32 to vector<16x128xf32>
    %337 = arith.addf %334, %336 : vector<16x128xf32>
    %338 = arith.negf %337 : vector<16x128xf32>
    %339 = math.exp %338 : vector<16x128xf32>
    %cst_164 = arith.constant 1.000000e+00 : f32
    %340 = vector.broadcast %cst_164 : f32 to vector<16x128xf32>
    %341 = arith.addf %340, %339 : vector<16x128xf32>
    %342 = arith.divf %340, %341 : vector<16x128xf32>
    %c0_165 = arith.constant 0 : index
    %c3_166 = arith.constant 3 : index
    %343 = memref.load %arg4[%c0_165, %c3_166] : memref<6x4xf32, #tpu.memory_space<smem>>
    %344 = vector.broadcast %343 : f32 to vector<16x128xf32>
    %345 = arith.mulf %54, %344 : vector<16x128xf32>
    %c1_167 = arith.constant 1 : index
    %c3_168 = arith.constant 3 : index
    %346 = memref.load %arg4[%c1_167, %c3_168] : memref<6x4xf32, #tpu.memory_space<smem>>
    %347 = vector.broadcast %346 : f32 to vector<16x128xf32>
    %348 = arith.mulf %93, %347 : vector<16x128xf32>
    %349 = arith.addf %345, %348 : vector<16x128xf32>
    %c2_169 = arith.constant 2 : index
    %c3_170 = arith.constant 3 : index
    %350 = memref.load %arg4[%c2_169, %c3_170] : memref<6x4xf32, #tpu.memory_space<smem>>
    %351 = vector.broadcast %350 : f32 to vector<16x128xf32>
    %352 = arith.mulf %132, %351 : vector<16x128xf32>
    %353 = arith.addf %349, %352 : vector<16x128xf32>
    %c3_171 = arith.constant 3 : index
    %c3_172 = arith.constant 3 : index
    %354 = memref.load %arg4[%c3_171, %c3_172] : memref<6x4xf32, #tpu.memory_space<smem>>
    %355 = vector.broadcast %354 : f32 to vector<16x128xf32>
    %356 = arith.mulf %171, %355 : vector<16x128xf32>
    %357 = arith.addf %353, %356 : vector<16x128xf32>
    %c4_173 = arith.constant 4 : index
    %c3_174 = arith.constant 3 : index
    %358 = memref.load %arg4[%c4_173, %c3_174] : memref<6x4xf32, #tpu.memory_space<smem>>
    %359 = vector.broadcast %358 : f32 to vector<16x128xf32>
    %360 = arith.mulf %210, %359 : vector<16x128xf32>
    %361 = arith.addf %357, %360 : vector<16x128xf32>
    %c5_175 = arith.constant 5 : index
    %c3_176 = arith.constant 3 : index
    %362 = memref.load %arg4[%c5_175, %c3_176] : memref<6x4xf32, #tpu.memory_space<smem>>
    %363 = vector.broadcast %362 : f32 to vector<16x128xf32>
    %364 = arith.mulf %249, %363 : vector<16x128xf32>
    %365 = arith.addf %361, %364 : vector<16x128xf32>
    %c3_177 = arith.constant 3 : index
    %366 = memref.load %arg5[%c3_177] : memref<4xf32, #tpu.memory_space<smem>>
    %367 = vector.broadcast %366 : f32 to vector<16x128xf32>
    %368 = arith.addf %365, %367 : vector<16x128xf32>
    %369 = arith.negf %368 : vector<16x128xf32>
    %370 = math.exp %369 : vector<16x128xf32>
    %cst_178 = arith.constant 1.000000e+00 : f32
    %371 = vector.broadcast %cst_178 : f32 to vector<16x128xf32>
    %372 = arith.addf %371, %370 : vector<16x128xf32>
    %373 = arith.divf %371, %372 : vector<16x128xf32>
    %c0_179 = arith.constant 0 : index
    %c0_180 = arith.constant 0 : index
    %374 = memref.load %arg6[%c0_179, %c0_180] : memref<4x1xf32, #tpu.memory_space<smem>>
    %375 = vector.broadcast %374 : f32 to vector<16x128xf32>
    %376 = arith.mulf %280, %375 : vector<16x128xf32>
    %c1_181 = arith.constant 1 : index
    %c0_182 = arith.constant 0 : index
    %377 = memref.load %arg6[%c1_181, %c0_182] : memref<4x1xf32, #tpu.memory_space<smem>>
    %378 = vector.broadcast %377 : f32 to vector<16x128xf32>
    %379 = arith.mulf %311, %378 : vector<16x128xf32>
    %380 = arith.addf %376, %379 : vector<16x128xf32>
    %c2_183 = arith.constant 2 : index
    %c0_184 = arith.constant 0 : index
    %381 = memref.load %arg6[%c2_183, %c0_184] : memref<4x1xf32, #tpu.memory_space<smem>>
    %382 = vector.broadcast %381 : f32 to vector<16x128xf32>
    %383 = arith.mulf %342, %382 : vector<16x128xf32>
    %384 = arith.addf %380, %383 : vector<16x128xf32>
    %c3_185 = arith.constant 3 : index
    %c0_186 = arith.constant 0 : index
    %385 = memref.load %arg6[%c3_185, %c0_186] : memref<4x1xf32, #tpu.memory_space<smem>>
    %386 = vector.broadcast %385 : f32 to vector<16x128xf32>
    %387 = arith.mulf %373, %386 : vector<16x128xf32>
    %388 = arith.addf %384, %387 : vector<16x128xf32>
    %c0_187 = arith.constant 0 : index
    %389 = memref.load %arg7[%c0_187] : memref<1xf32, #tpu.memory_space<smem>>
    %390 = vector.broadcast %389 : f32 to vector<16x128xf32>
    %391 = arith.addf %388, %390 : vector<16x128xf32>
    %c0_188 = arith.constant 0 : index
    %c0_189 = arith.constant 0 : index
    %392 = vector.load %arg8[%c0_188, %c0_189] : memref<16x128xf32, #tpu.memory_space<vmem>>, vector<16x128xf32>
    tpu.vector_store %arg8[%c0_188, %c0_189], %391 {strides = array<i32>} : memref<16x128xf32, #tpu.memory_space<vmem>>, vector<16x128xf32>,
    return
  }
  func.func @transform_0(%arg0: i32) -> (i32, i32, i32) {
    %c0_i32 = arith.constant 0 : i32
    %c0_i32_0 = arith.constant 0 : i32
    %c0_i32_1 = arith.constant 0 : i32
    return %c0_i32, %arg0, %c0_i32_0 : i32, i32, i32
  }
  func.func @transform_1(%arg0: i32) -> (i32, i32) {
    %c0_i32 = arith.constant 0 : i32
    %c0_i32_0 = arith.constant 0 : i32
    %c0_i32_1 = arith.constant 0 : i32
    return %c0_i32, %c0_i32_0 : i32, i32
  }
  func.func @transform_2(%arg0: i32) -> i32 {
    %c0_i32 = arith.constant 0 : i32
    %c0_i32_0 = arith.constant 0 : i32
    return %c0_i32 : i32
  }
  func.func @transform_3(%arg0: i32) -> (i32, i32) {
    %c0_i32 = arith.constant 0 : i32
    %c0_i32_0 = arith.constant 0 : i32
    %c0_i32_1 = arith.constant 0 : i32
    return %c0_i32, %c0_i32_0 : i32, i32
  }
  func.func @transform_4(%arg0: i32) -> i32 {
    %c0_i32 = arith.constant 0 : i32
    %c0_i32_0 = arith.constant 0 : i32
    return %c0_i32 : i32
  }
  func.func @transform_5(%arg0: i32) -> (i32, i32) {
    %c0_i32 = arith.constant 0 : i32
    %c0_i32_0 = arith.constant 0 : i32
    %c0_i32_1 = arith.constant 0 : i32
    return %c0_i32, %c0_i32_0 : i32, i32
  }
  func.func @transform_6(%arg0: i32) -> i32 {
    %c0_i32 = arith.constant 0 : i32
    %c0_i32_0 = arith.constant 0 : i32
    return %c0_i32 : i32
  }
  func.func @transform_7(%arg0: i32) -> (i32, i32) {
    %c0_i32 = arith.constant 0 : i32
    %c0_i32_0 = arith.constant 0 : i32
    return %arg0, %c0_i32 : i32, i32
  }
}

</mosaic_0001>

<bundles_post_ra>
// kernel: tpu_custom_call.1
= control target key start
LH: loop header
LB: loop body
LE: loop exit
PB: predicated region body
PF: predicated region fallthrough
CT: control target
= control target key end

     0   :  { %s2325_s0 = inlined_call_operand.hbm [shape: f32[8,32,128], index: 0, kind: input, shape index: {}]   ;;  %s2326_s1 = inlined_call_operand.vmem [shape: f32[8,6], index: 1, kind: input, shape index: {}]   ;;  %s2327_s2 = inlined_call_operand.vmem [shape: f32[6], index: 2, kind: input, shape index: {}]   ;;  %s2328_s3 = inlined_call_operand.vmem [shape: f32[6,4], index: 3, kind: input, shape index: {}]   ;;  %s2329_s4 = inlined_call_operand.vmem [shape: f32[4], index: 4, kind: input, shape index: {}]   ;;  %s2330_s5 = inlined_call_operand.vmem [shape: f32[4,1], index: 5, kind: input, shape index: {}]   ;;  %s2331_s6 = inlined_call_operand.<no memory space> [shape: f32[1], index: 6, kind: input, shape index: {}]   ;;  %s2332_s7 = inlined_call_operand.hbm [shape: f32[32,128], index: 7, kind: output, shape index: {}]  }
   0x1   :  { %2338 = sst [smem:[#allocation23_spill]] %s2326_s1 }
   0x2   :  { %2339 = sst [smem:[#allocation24_spill]] %s2327_s2 }
   0x3   :  { %12 = sst [smem:[#allocation2]] %s2331_s6 }
   0x4   :  { %13 = vsyncpa [#allocation4], 0 }
   0x5   :  { %15 = vsyncpa [#allocation4 + $0x1], 0 }
   0x6   :  { %16 = vsyncpa [#allocation6], 0 }
   0x7   :  { %17 = vsyncpa [#allocation9], 0 }
   0x8   :  { %18 = vsyncpa [#allocation12], 0 }
   0x9   :  { %19 = vsyncpa [#allocation5], 0 }
   0xa   :  { %21 = vsyncpa [#allocation5 + $0x1], 0  ;;  %s1689_s26 = smov 0   ;;  %s1691_s27 = smov 0  }
   0xb   :  { %s1693_s28 = smov 0   ;;  %s1695_s29 = smov 0  }
   0xc LB: > { %s1710_s6 = sadd.s32 4294967295, %s1630_s29   ;;  %s1149_s30 = sadd.s32 4294967294, %s1630_s29   ;;  %s1630_s29 = sphi %s1695_s29, %s2363_s29   ;;  %s1626_s28 = sphi %s1693_s28, %s2362_s28   ;;  %s1622_s27 = sphi %s1691_s27, %s2361_s27   ;;  %s1618_s26 = sphi %s1689_s26, %s2360_s26  }
   0xd   : > { %s1714_s8 = sadd.s32 1, %s1630_s29   ;;  %s34_s9 = sadd.s32 1, %s1626_s28 }
   0xe   : > { %s31_s10 = ssub.s32 %s1630_s29, %s1714_s8  ;;  %p41_p0 = scmp.ne.s32.totalorder %s1626_s28, %s1622_s27 }
   0xf   : > { %p32_p1 = scmp.eq.s32.totalorder %s31_s10, 0  ;;  %p42_p2 = scmp.eq.s32.totalorder %s1630_s29, 0 }
  0x10   : > { %p47_p3 = scmp.ne.s32.totalorder %s1622_s27, %s1618_s26  ;;  %p2333_p4 = scmp.eq.s32.totalorder %s1710_s6, 0 }
  0x11   : > { %s1726_s11 = scalar_select %p32_p1, %s1626_s28, %s34_s9  }
  0x12   : > { %p1728_p5 = por %p42_p2, %p41_p0  ;;  %p1734_p6 = por %p2333_p4, %p47_p3 }
  0x13   : > { %p197_p7 = scmp.eq.s32.totalorder %s1710_s6, 1  ;;  %p203_p8 = scmp.eq.s32.totalorder %s1149_s30, 1 }
  0x14   : > { %s2340_s12 = scalar_select %p1728_p5, 1, 0 }
  0x15   : > { %s2341_s13 = scalar_select %p1734_p6, 1, 0 }
  0x16   : > { %p1150_p9 = scmp.ge.s32.totalorder %s1630_s29, 1  ;;  %p210_p10 = scmp.lt.s32.totalorder %s1630_s29, 3 }
  0x17   : > { %p1741_p11 = por %p197_p7, %p41_p0  ;;  %p1745_p12 = por %p203_p8, %p47_p3 }
  0x18   : > { %p1749_p13 = pnand %p1150_p9, %p210_p10  ;;  %s2345_s2 = sld [smem:[#allocation24_spill]] }
  0x19   : > { %s2342_s14 = scalar_select %p1741_p11, 1, 0 }
  0x1a   : > { %s2343_s15 = scalar_select %p1745_p12, 1, 0 }
  0x1b   : > { %s2344_s16 = scalar_select %p1749_p13, 1, 0 }
  0x1c   : > { %p1323_p1 = pneg %p1749_p13  ;;  %s256_s22 = sshll.u32 %s2329_s4, 4  ;;  %s257_s22 = int_to_ptr.vmem [resolvable:$true] %s256_s22 }
  0x1d   : > { %s2347_s1 = sld [smem:[#allocation23_spill]] }
  0x1e   : > { %s234_s19 = sshll.u32 %s2345_s2, 4  ;;  %p1763_p0 = pnand %p1323_p1, %p2333_p4  ;;  %s235_s19 = int_to_ptr.vmem [resolvable:$true] %s234_s19 }
  0x1f   : > { %s1479_s9 = scalar_lea.vmem %s235_s19, 16  ;;  %p1487_p9 = scmp.lt.s32.totalorder %s235_s19, %s235_s19 }
  0x20   : > { %p1480_p2 = scmp.ne.s32.totalorder %s235_s19, %s1479_s9  ;;  %p1774_p3 = pneg %p1763_p0 }
  0x21   : > { %p1488_p10 = scmp.lt.s32.totalorder %s1479_s9, %s1479_s9 }
  0x22   : > { %p1482_p7 = pnand %p1774_p3, %p1480_p2 }
  0x23   : > { %s223_s30 = sshll.u32 %s2347_s1, 4  ;;  %p1489_p1 = por %p1488_p10, %p1487_p9  ;;  %s1770_s30 = int_to_ptr.vmem [resolvable:$true] %s223_s30 }
  0x24   : > { %p1483_p8 = pneg %p1482_p7 }
  0x26   : > { %p1490_p4 = pnand %p1489_p1, %p1483_p8 }
  0x28   : > { %1493 = shalt.err (!%p1490_p4)
}
  0x29   : > { %s1632_s17 = smov [#allocation8]   ;;  %s1494_s18 = scalar_lea.vmem %s257_s22, 16 }
  0x2a   : > { %1329 = dma.vmem_to_smem (!%p1763_p0), %s235_s19, 16, %s1632_s17, [#allocation9]  }
  0x2b   : > { %p1495_p12 = scmp.ne.s32.totalorder %s257_s22, %s1494_s18  ;;  %p1502_p13 = scmp.lt.s32.totalorder %s257_s22, %s257_s22 }
  0x2c   : > { %p1503_p5 = scmp.lt.s32.totalorder %s1494_s18, %s1494_s18 }
  0x2d   : > { %p1497_p11 = pnand %p1495_p12, %p1774_p3 }
  0x2e   : > { %p1504_p2 = por %p1503_p5, %p1502_p13 }
  0x2f   : > { %p1498_p6 = pneg %p1497_p11 }
  0x31   : > { %p1505_p7 = pnand %p1504_p2, %p1498_p6 }
  0x33   : > { %1508 = shalt.err (!%p1505_p7)
}
  0x34   : > { %s1633_s20 = smov [#allocation11]   ;;  %s1509_s21 = scalar_lea.vmem %s1770_s30, 128 }
  0x35   : > { %1335 = dma.vmem_to_smem (!%p1763_p0), %s257_s22, 16, %s1633_s20, [#allocation12]  }
  0x36   : > { %p1510_p4 = scmp.ne.s32.totalorder %s1770_s30, %s1509_s21  ;;  %p1517_p11 = scmp.lt.s32.totalorder %s1770_s30, %s1770_s30 }
  0x37   : > { %p1518_p12 = scmp.lt.s32.totalorder %s1509_s21, %s1509_s21 }
  0x38   : > { %p1512_p8 = pnand %p1510_p4, %p1774_p3 }
  0x39   : > { %p1519_p10 = por %p1518_p12, %p1517_p11 }
  0x3a   : > { %p1513_p9 = pneg %p1512_p8 }
  0x3c   : > { %p1520_p5 = pnand %p1519_p10, %p1513_p9 }
  0x3e   : > { %1523 = shalt.err (!%p1520_p5)
}
  0x3f   : > { %s1634_s19 = smov [#allocation7]   ;;  %s245_s22 = sshll.u32 %s2328_s3, 4  ;;  %s246_s22 = int_to_ptr.vmem [resolvable:$true] %s245_s22 }
  0x40   : > { %1326 = dma.vmem_to_smem (!%p1763_p0), %s1770_s30, 128, %s1634_s19, [#allocation6]  }
  0x41   : > { %s267_s18 = sshll.u32 %s2330_s5, 4  ;;  %s1524_s20 = scalar_lea.vmem %s246_s22, 128  ;;  %s268_s18 = int_to_ptr.vmem [resolvable:$true] %s267_s18 }
  0x42   : > { %p1525_p6 = scmp.ne.s32.totalorder %s246_s22, %s1524_s20  ;;  %p1532_p2 = scmp.lt.s32.totalorder %s246_s22, %s246_s22 }
  0x43   : > { %p1533_p7 = scmp.lt.s32.totalorder %s1524_s20, %s1524_s20 }
  0x44   : > { %p1527_p13 = pnand %p1525_p6, %p1774_p3 }
  0x45   : > { %p1534_p4 = por %p1533_p7, %p1532_p2 }
  0x46   : > { %p1528_p1 = pneg %p1527_p13 }
  0x48   : > { %p1535_p8 = pnand %p1534_p4, %p1528_p1 }
  0x4a   : > { %1538 = shalt.err (!%p1535_p8)
}
  0x4b   : > { %s1635_s30 = smov [#allocation10]   ;;  %s1539_s21 = scalar_lea.vmem %s268_s18, 64 }
  0x4c   : > { %1332 = dma.vmem_to_smem (!%p1763_p0), %s246_s22, 128, %s1635_s30, [#allocation9]  }
  0x4d   : > { %p1540_p9 = scmp.ne.s32.totalorder %s268_s18, %s1539_s21  ;;  %p1547_p10 = scmp.lt.s32.totalorder %s268_s18, %s268_s18 }
  0x4e   : > { %p1548_p5 = scmp.lt.s32.totalorder %s1539_s21, %s1539_s21 }
  0x4f   : > { %p1542_p11 = pnand %p1540_p9, %p1774_p3 }
  0x50   : > { %p1549_p6 = por %p1548_p5, %p1547_p10 }
  0x51   : > { %p1543_p12 = pneg %p1542_p11 }
  0x53   : > { %p1550_p13 = pnand %p1549_p6, %p1543_p12 }
  0x55   : > { %1553 = shalt.err (!%p1550_p13)
}
  0x56   : > { %s1636_s19 = smov [#allocation13]   ;;  %p1156_p1 = scmp.ge.s32.totalorder %s1630_s29, 2 }
  0x57   : > { %1338 = dma.vmem_to_smem (!%p1763_p0), %s268_s18, 64, %s1636_s19, [#allocation12]  }
  0x58   : > { %277 = sbr.rel (%p1156_p1) target bundleno = 108 (0x6c), region = 40 }
  0x5d   : > { %s281_s10 = sand.u32 1, %s1626_s28   ;;  %s1290_s24 = sshll.u32 %s1630_s29, 8 }
  0x5e   : > { %s1157_s25 = sshll.u32 %s281_s10, 7  ;;  %s291_s23 = scalar_lea.hbm %s2325_s0, %s1290_s24 }
  0x5f   : > { %p2349_p0 = scmp.ne.s32.totalorder %s2340_s12, 0  ;;  %s285_s18 = scalar_lea.vmem [#allocation3], %s1157_s25 }
  0x60   : > { %s304_s20 = sshll.u32 %s285_s18, 4  ;;  %s1637_s21 = smov 512   ;;  %s305_s20 = int_to_ptr.vmem [resolvable:$true] %s304_s20 }
  0x61   : > { %s1302_s17 = scalar_select %p2349_p0, [#allocation0], [#allocation17] }
  0x62   : > { %1303 = sst [smem:[#allocation16]] (%p2349_p0), %s1637_s21  ;;  %s1638_s19 = smov 256  }
  0x63   : > { %s296_s30 = sld [smem:[%s1302_s17]]   ;;  %s1639_s1 = smov 2  }
  0x64   : > { %1304 = sst [smem:[#allocation16 + $0x1]] (%p2349_p0), %s1638_s19  ;;  %s1640_s2 = smov 128  }
  0x65   : > { %1305 = sst [smem:[#allocation16 + $0x2]] (%p2349_p0), %s1639_s1  ;;  %s1641_s25 = smov 8  }
  0x66   : > { %1306 = sst [smem:[#allocation16 + $0x3]] (%p2349_p0), %s1640_s2  ;;  %s282_s9 = scalar_lea.sflag [#allocation4], %s281_s10 }
  0x67   : > { %1307 = sst [smem:[#allocation16 + $0x4]] (%p2349_p0), %s1640_s2  ;;  %s1642_s17 = smov 131072  }
  0x68   : > { %1308 = sst [smem:[#allocation16 + $0x5]] (%p2349_p0), %s1641_s25 }
  0x69   : > { %s1160_s24 = sshll.u32 %s296_s30, 26 }
  0x6a   : > { %s1161_s22 = sadd.s32 134217728, %s1160_s24 }
  0x6b   : > { %1309 = dma.general (%p2349_p0), %s291_s23, 2048, %s305_s20, %s282_s9, %s1642_s17, [#allocation16], %s1161_s22, 0  }
  0x6c PF: > { %p2350_p3 = scmp.ne.s32.totalorder %s2344_s16, 0 }
  0x6d   : > { %s1836_s1 = sand.u32 (!%p2350_p3), 1, %s1622_s27   ;;  %p2351_p2 = scmp.ne.s32.totalorder (!%p2350_p3), %s2341_s13, 0 }
  0x6e   : > { %329 = sbr.rel (%p2350_p3) target bundleno = 309 (0x135), region = 48  ;;  %s1163_s2 = sshll.u32 (!%p2350_p3), %s1836_s1, 7 }
  0x6f   : > { %s332_s18 = scalar_lea.sflag (!%p2350_p3), [#allocation4], %s1836_s1  ;;  %s1840_s30 = scalar_lea.vmem (!%p2350_p3), [#allocation3], %s1163_s2 }
  0x73   : > { %1597 = dma.done.wait (%p2351_p2), %s332_s18, 2048  }
  0x74   : > { %1599 = vsyncadd (%p2351_p2), %s332_s18, 4294965248  ;;  %p2352_p7 = scmp.eq.s32.totalorder %s1710_s6, 0 }
  0x76   : > { %1601 = dma.done.wait (%p2352_p7), [#allocation6], 128   ;;  %p2353_p4 = pmov %p2352_p7 }
  0x78   : > { %1603 = vsyncadd (%p2353_p4), [#allocation6], 4294967168  ;;  %p2354_p8 = pmov %p2353_p4 }
  0x79   : > { %p2355_p9 = pmov %p2353_p4 }
  0x7a   : > { %1605 = dma.done.wait (%p2354_p8), [#allocation9], 144  }
  0x7b   : > { %1607 = vsyncadd (%p2355_p9), [#allocation9], 4294967152  ;;  %p2356_p11 = pmov %p2353_p4 }
  0x7c   : > { %p2357_p12 = pmov %p2353_p4 }
  0x7d   : > { %1609 = dma.done.wait (%p2356_p11), [#allocation12], 80  }
  0x7e   : > { %1611 = vsyncadd (%p2357_p12), [#allocation12], 4294967216 }
  0x7f   : > { %360 = sfence }
  0x80   : > { %s412_s12 = sld [smem:[#allocation7]]  ;;  %v1859_v0 = vld [vmem:[%s1840_s30] sm:$0xff]  ;;  %v1862_v1 = vld [vmem:[%s1840_s30 + $0x8] sm:$0xff]  ;;  %v1867_v2 = vld [vmem:[%s1840_s30 + $0x10] sm:$0xff]  ;;  %p2358_p5 = scmp.ne.s32.totalorder %s2342_s14, 0 }
  0x81   : > { %s1184_s13 = sld [smem:[#allocation7 + $0x80]]  ;;  %v1870_v3 = vld [vmem:[%s1840_s30 + $0x18] sm:$0xff]  ;;  %v1875_v4 = vld [vmem:[%s1840_s30 + $0x20] sm:$0xff]  ;;  %v1878_v5 = vld [vmem:[%s1840_s30 + $0x28] sm:$0xff] }
  0x82   : > { %s1185_s16 = sld [smem:[#allocation7 + $0x100]]  ;;  %v1883_v7 = vld [vmem:[%s1840_s30 + $0x30] sm:$0xff]  ;;  %v1886_v8 = vld [vmem:[%s1840_s30 + $0x38] sm:$0xff]  ;;  %v1897_v15 = vld [vmem:[%s1840_s30 + $0x40] sm:$0xff] }
  0x83   : > { %s1186_s10 = sld [smem:[#allocation7 + $0x180]]  ;;  %v1900_v16 = vld [vmem:[%s1840_s30 + $0x48] sm:$0xff]  ;;  %v1911_v24 = vld [vmem:[%s1840_s30 + $0x50] sm:$0xff]  ;;  %v1914_v25 = vld [vmem:[%s1840_s30 + $0x58] sm:$0xff] }
  0x84   : > { %s1864_s23 = sld [smem:[#allocation7 + $0x200]]  ;;  %v1921_v28 = vld [vmem:[%s1840_s30 + $0x60] sm:$0xff]  ;;  %v1924_v29 = vld [vmem:[%s1840_s30 + $0x68] sm:$0xff]  ;;  %v1927_v30 = vld [vmem:[%s1840_s30 + $0x70] sm:$0xff] }
  0x85   : > { %s1872_s20 = sld [smem:[#allocation7 + $0x280]]  ;;  %v1938_v37 = vld [vmem:[%s1840_s30 + $0x78] sm:$0xff] }
  0x86   : > { %v413_v6 = vstv %s412_s12  ;;  %s1880_s21 = sld [smem:[#allocation7 + $0x300]] }
  0x87   : > { %v414_v9 = vmul.f32 %v413_v6, %v1859_v0  ;;  %v415_v10 = vmul.f32 %v413_v6, %v1862_v1  ;;  %v417_v11 = vstv %s1184_s13  ;;  %s1890_s19 = sld [smem:[#allocation7 + $0x380]] }
  0x88   : > { %v418_v12 = vmul.f32 %v1867_v2, %v417_v11  ;;  %v419_v13 = vmul.f32 %v1870_v3, %v417_v11  ;;  %v423_v14 = vstv %s1185_s16  ;;  %s1894_s24 = sld [smem:[#allocation8]] }
  0x89   : > { %v424_v17 = vmul.f32 %v1875_v4, %v423_v14  ;;  %v425_v18 = vmul.f32 %v1878_v5, %v423_v14  ;;  %v429_v19 = vstv %s1186_s10  ;;  %s1904_s25 = sld [smem:[#allocation7 + $0x1]] }
  0x8a   : > { %v420_v20 = vadd.f32 %v418_v12, %v414_v9  ;;  %v421_v21 = vadd.f32 %v419_v13, %v415_v10  ;;  %v430_v22 = vmul.f32 %v1883_v7, %v429_v19  ;;  %v431_v23 = vmul.f32 %v1886_v8, %v429_v19  ;;  %s1908_s22 = sld [smem:[#allocation7 + $0x81]] }
  0x8b   : > { %v435_v26 = vstv %s1864_s23  ;;  %v441_v27 = vstv %s1872_s20  ;;  %s1918_s9 = sld [smem:[#allocation7 + $0x101]] }
  0x8c   : > { %v426_v31 = vadd.f32 %v424_v17, %v420_v20  ;;  %v427_v32 = vadd.f32 %v425_v18, %v421_v21  ;;  %v436_v33 = vmul.f32 %v1897_v15, %v435_v26  ;;  %v437_v34 = vmul.f32 %v1900_v16, %v435_v26  ;;  %s1931_s17 = sld [smem:[#allocation7 + $0x181]] }
  0x8d   : > { %v447_v35 = vstv %s1880_s21  ;;  %v453_v36 = vstv %s1890_s19  ;;  %s1935_s2 = sld [smem:[#allocation7 + $0x201]]  ;;  %v442_v40 = vmul.f32 %v1911_v24, %v441_v27  ;;  %v443_v41 = vmul.f32 %v1914_v25, %v441_v27 }
  0x8e   : > { %v432_v38 = vadd.f32 %v430_v22, %v426_v31  ;;  %v433_v39 = vadd.f32 %v431_v23, %v427_v32  ;;  %s1942_s18 = sld [smem:[#allocation7 + $0x281]]  ;;  %v448_v42 = vmul.f32 %v1921_v28, %v447_v35  ;;  %v449_v43 = vmul.f32 %v1924_v29, %v447_v35 }
  0x8f   : > { %v454_v44 = vmul.f32 %v1927_v30, %v453_v36  ;;  %v475_v45 = vstv %s1904_s25  ;;  %s1948_s30 = sld [smem:[#allocation7 + $0x301]]  ;;  %v455_v50 = vmul.f32 %v1938_v37, %v453_v36  ;;  %v459_v51 = vstv %s1894_s24 }
  0x90   : > { %v438_v46 = vadd.f32 %v436_v33, %v432_v38  ;;  %v439_v47 = vadd.f32 %v437_v34, %v433_v39  ;;  %v476_v48 = vmul.f32 %v475_v45, %v1859_v0  ;;  %v477_v49 = vmul.f32 %v475_v45, %v1862_v1  ;;  %s1952_s12 = sld [smem:[#allocation7 + $0x381]] }
  0x91   : > { %v479_v52 = vstv %s1908_s22  ;;  %v485_v53 = vstv %s1918_s9  ;;  %s1958_s13 = sld [smem:[#allocation8 + $0x1]] }
  0x92   : > { %v444_v54 = vadd.f32 %v442_v40, %v438_v46  ;;  %v445_v55 = vadd.f32 %v443_v41, %v439_v47  ;;  %v480_v56 = vmul.f32 %v1867_v2, %v479_v52  ;;  %v481_v57 = vmul.f32 %v1870_v3, %v479_v52  ;;  %s1962_s16 = sld [smem:[#allocation7 + $0x2]] }
  0x93   : > { %v486_v58 = vmul.f32 %v1875_v4, %v485_v53  ;;  %v487_v59 = vmul.f32 %v1878_v5, %v485_v53  ;;  %v491_v60 = vstv %s1931_s17  ;;  %v497_v61 = vstv %s1935_s2  ;;  %s1968_s10 = sld [smem:[#allocation7 + $0x82]] }
  0x94   : > { %v450_v62 = vadd.f32 %v448_v42, %v444_v54  ;;  %v451_v63 = vadd.f32 %v449_v43, %v445_v55  ;;  %v482_v6 = vadd.f32 %v480_v56, %v476_v48  ;;  %v483_v9 = vadd.f32 %v481_v57, %v477_v49  ;;  %s1974_s23 = sld [smem:[#allocation7 + $0x102]] }
  0x95   : > { %v492_v10 = vmul.f32 %v1883_v7, %v491_v60  ;;  %v493_v11 = vmul.f32 %v1886_v8, %v491_v60  ;;  %v498_v12 = vmul.f32 %v1897_v15, %v497_v61  ;;  %v499_v13 = vmul.f32 %v1900_v16, %v497_v61  ;;  %s1976_s20 = sld [smem:[#allocation7 + $0x182]] }
  0x96   : > { %v456_v14 = vadd.f32 %v454_v44, %v450_v62  ;;  %v457_v17 = vadd.f32 %v455_v50, %v451_v63  ;;  %v488_v18 = vadd.f32 %v486_v58, %v482_v6  ;;  %v489_v19 = vadd.f32 %v487_v59, %v483_v9  ;;  %s1982_s21 = sld [smem:[#allocation7 + $0x202]] }
  0x97   : > { %v503_v20 = vstv %s1942_s18  ;;  %v509_v21 = vstv %s1948_s30  ;;  %v515_v22 = vstv %s1952_s12  ;;  %v521_v23 = vstv %s1958_s13  ;;  %s1988_s19 = sld [smem:[#allocation7 + $0x282]] }
  0x98   : > { %v460_v26 = vadd.f32 %v459_v51, %v456_v14  ;;  %v461_v27 = vadd.f32 %v459_v51, %v457_v17  ;;  %v494_v31 = vadd.f32 %v492_v10, %v488_v18  ;;  %v495_v32 = vadd.f32 %v493_v11, %v489_v19  ;;  %s1994_s24 = sld [smem:[#allocation7 + $0x302]] }
  0x99   : > { %v504_v33 = vmul.f32 %v1911_v24, %v503_v20  ;;  %v505_v34 = vmul.f32 %v1914_v25, %v503_v20  ;;  %v510_v35 = vmul.f32 %v1921_v28, %v509_v21  ;;  %v511_v36 = vmul.f32 %v1924_v29, %v509_v21  ;;  %s1997_s25 = sld [smem:[#allocation7 + $0x382]] }
  0x9a   : > { %v1191_v38 = vmul.f32 -1.442695, %v460_v26  ;;  %v1192_v39 = vmul.f32 -1.442695, %v461_v27  ;;  %v500_v40 = vadd.f32 %v498_v12, %v494_v31  ;;  %v501_v41 = vadd.f32 %v499_v13, %v495_v32  ;;  %s2002_s22 = sld [smem:[#allocation8 + $0x2]] }
  0x9b   : > { %v516_v42 = vmul.f32 %v1927_v30, %v515_v22  ;;  %v517_v43 = vmul.f32 %v1938_v37, %v515_v22  ;;  %v537_v44 = vstv %s1962_s16  ;;  %v541_v45 = vstv %s1968_s10  ;;  %s2006_s9 = sld [smem:[#allocation7 + $0x3]] }
  0x9c   : > { %1399 = vpow2.f32 %v1191_v38  ;;  %v506_v46 = vadd.f32 %v504_v33, %v500_v40  ;;  %v507_v47 = vadd.f32 %v505_v34, %v501_v41  ;;  %v538_v48 = vmul.f32 %v537_v44, %v1859_v0  ;;  %s2010_s17 = sld [smem:[#allocation7 + $0x83]] }
  0x9d   : > { %1401 = vpow2.f32 %v1192_v39  ;;  %v539_v49 = vmul.f32 %v537_v44, %v1862_v1  ;;  %v542_v50 = vmul.f32 %v1867_v2, %v541_v45  ;;  %v543_v51 = vmul.f32 %v1870_v3, %v541_v45  ;;  %s2014_s2 = sld [smem:[#allocation7 + $0x103]] }
  0x9e   : > { %v512_v52 = vadd.f32 %v510_v35, %v506_v46  ;;  %v513_v53 = vadd.f32 %v511_v36, %v507_v47  ;;  %v547_v54 = vstv %s1974_s23  ;;  %v553_v55 = vstv %s1976_s20  ;;  %s2020_s18 = sld [smem:[#allocation7 + $0x183]] }
  0x9f   : > { %v544_v56 = vadd.f32 %v542_v50, %v538_v48  ;;  %v545_v57 = vadd.f32 %v543_v51, %v539_v49  ;;  %v548_v58 = vmul.f32 %v1875_v4, %v547_v54  ;;  %v549_v59 = vmul.f32 %v1878_v5, %v547_v54  ;;  %s2026_s30 = sld [smem:[#allocation7 + $0x203]] }
  0xa0   : > { %v518_v60 = vadd.f32 %v516_v42, %v512_v52  ;;  %v519_v61 = vadd.f32 %v517_v43, %v513_v53  ;;  %v554_v62 = vmul.f32 %v1883_v7, %v553_v55  ;;  %v555_v63 = vmul.f32 %v1886_v8, %v553_v55  ;;  %s2030_s12 = sld [smem:[#allocation7 + $0x283]] }
  0xa1   : > { %v550_v6 = vadd.f32 %v548_v58, %v544_v56  ;;  %v551_v9 = vadd.f32 %v549_v59, %v545_v57  ;;  %v559_v10 = vstv %s1982_s21  ;;  %v565_v11 = vstv %s1988_s19  ;;  %s2035_s13 = sld [smem:[#allocation7 + $0x303]] }
  0xa2   : > { %v522_v12 = vadd.f32 %v521_v23, %v518_v60  ;;  %v523_v13 = vadd.f32 %v521_v23, %v519_v61  ;;  %v560_v14 = vmul.f32 %v1897_v15, %v559_v10  ;;  %v561_v17 = vmul.f32 %v1900_v16, %v559_v10  ;;  %s2044_s16 = sld [smem:[#allocation7 + $0x383]] }
  0xa3   : > { %v556_v18 = vadd.f32 %v554_v62, %v550_v6  ;;  %v557_v19 = vadd.f32 %v555_v63, %v551_v9  ;;  %v566_v20 = vmul.f32 %v1911_v24, %v565_v11  ;;  %v567_v21 = vmul.f32 %v1914_v25, %v565_v11  ;;  %s2049_s10 = sld [smem:[#allocation8 + $0x3]] }
  0xa4   : > { %v1202_v22 = vmul.f32 -1.442695, %v522_v12  ;;  %v1203_v26 = vmul.f32 -1.442695, %v523_v13  ;;  %v571_v27 = vstv %s1994_s24  ;;  %v577_v31 = vstv %s1997_s25  ;;  %s2051_s23 = sld [smem:[#allocation7 + $0x4]] }
  0xa5   : > { %v562_v23 = vadd.f32 %v560_v14, %v556_v18  ;;  %v563_v32 = vadd.f32 %v561_v17, %v557_v19  ;;  %v572_v33 = vmul.f32 %v1921_v28, %v571_v27  ;;  %v573_v34 = vmul.f32 %v1924_v29, %v571_v27  ;;  %s2055_s20 = sld [smem:[#allocation7 + $0x84]] }
  0xa6   : > { %1403 = vpow2.f32 %v1202_v22  ;;  %v578_v35 = vmul.f32 %v1927_v30, %v577_v31  ;;  %v579_v36 = vmul.f32 %v1938_v37, %v577_v31  ;;  %v583_v38 = vstv %s2002_s22  ;;  %s2057_s21 = sld [smem:[#allocation7 + $0x104]] }
  0xa7   : > { %1405 = vpow2.f32 %v1203_v26  ;;  %v568_v39 = vadd.f32 %v566_v20, %v562_v23  ;;  %v569_v40 = vadd.f32 %v567_v21, %v563_v32  ;;  %v599_v41 = vstv %s2006_s9  ;;  %s2066_s19 = sld [smem:[#allocation7 + $0x184]] }
  0xa8   : > { %v600_v42 = vmul.f32 %v599_v41, %v1859_v0  ;;  %v601_v43 = vmul.f32 %v599_v41, %v1862_v1  ;;  %v603_v44 = vstv %s2010_s17  ;;  %v609_v45 = vstv %s2014_s2  ;;  %s2070_s24 = sld [smem:[#allocation7 + $0x204]] }
  0xa9   : > { %v1400_v46 = vpop.eup %1399  ;;  %v574_v47 = vadd.f32 %v572_v33, %v568_v39  ;;  %v575_v48 = vadd.f32 %v573_v34, %v569_v40  ;;  %v604_v49 = vmul.f32 %v1867_v2, %v603_v44  ;;  %v605_v50 = vmul.f32 %v1870_v3, %v603_v44  ;;  %s2074_s25 = sld [smem:[#allocation7 + $0x284]] }
  0xaa   : > { %v1402_v51 = vpop.eup %1401  ;;  %v468_v52 = vadd.f32 1.0, %v1400_v46  ;;  %v610_v53 = vmul.f32 %v1875_v4, %v609_v45  ;;  %v611_v54 = vmul.f32 %v1878_v5, %v609_v45  ;;  %v615_v55 = vstv %s2020_s18  ;;  %s2079_s22 = sld [smem:[#allocation7 + $0x304]] }
  0xab   : > { %v469_v56 = vadd.f32 1.0, %v1402_v51  ;;  %v580_v57 = vadd.f32 %v578_v35, %v574_v47  ;;  %v581_v58 = vadd.f32 %v579_v36, %v575_v48  ;;  %v606_v59 = vadd.f32 %v604_v49, %v600_v42  ;;  %s2085_s9 = sld [smem:[#allocation7 + $0x384]] }
  0xac   : > { %1407 = vrcp.f32 %v468_v52  ;;  %v607_v60 = vadd.f32 %v605_v50, %v601_v43  ;;  %v616_v61 = vmul.f32 %v1883_v7, %v615_v55  ;;  %v617_v62 = vmul.f32 %v1886_v8, %v615_v55  ;;  %s2089_s17 = sld [smem:[#allocation8 + $0x4]] }
  0xad   : > { %1409 = vrcp.f32 %v469_v56  ;;  %v584_v63 = vadd.f32 %v583_v38, %v580_v57  ;;  %v585_v6 = vadd.f32 %v583_v38, %v581_v58  ;;  %v612_v9 = vadd.f32 %v610_v53, %v606_v59  ;;  %s2093_s2 = sld [smem:[#allocation7 + $0x5]] }
  0xae   : > { %v613_v10 = vadd.f32 %v611_v54, %v607_v60  ;;  %v621_v11 = vstv %s2026_s30  ;;  %v627_v12 = vstv %s2030_s12  ;;  %v633_v13 = vstv %s2035_s13  ;;  %s2096_s18 = sld [smem:[#allocation7 + $0x85]] }
  0xaf   : > { %v1213_v14 = vmul.f32 -1.442695, %v584_v63  ;;  %v1214_v17 = vmul.f32 -1.442695, %v585_v6  ;;  %v618_v18 = vadd.f32 %v616_v61, %v612_v9  ;;  %v622_v19 = vmul.f32 %v1897_v15, %v621_v11  ;;  %s2103_s30 = sld [smem:[#allocation7 + $0x105]] }
  0xb0   : > { %v619_v20 = vadd.f32 %v617_v62, %v613_v10  ;;  %v623_v21 = vmul.f32 %v1900_v16, %v621_v11  ;;  %v628_v22 = vmul.f32 %v1911_v24, %v627_v12  ;;  %v629_v26 = vmul.f32 %v1914_v25, %v627_v12  ;;  %s2108_s12 = sld [smem:[#allocation7 + $0x185]] }
  0xb1   : > { %1411 = vpow2.f32 %v1213_v14  ;;  %v624_v27 = vadd.f32 %v622_v19, %v618_v18  ;;  %v634_v31 = vmul.f32 %v1921_v28, %v633_v13  ;;  %v635_v23 = vmul.f32 %v1924_v29, %v633_v13  ;;  %s2113_s13 = sld [smem:[#allocation7 + $0x205]] }
  0xb2   : > { %1413 = vpow2.f32 %v1214_v17  ;;  %v625_v32 = vadd.f32 %v623_v21, %v619_v20  ;;  %v639_v33 = vstv %s2044_s16  ;;  %v645_v34 = vstv %s2049_s10  ;;  %s2120_s16 = sld [smem:[#allocation7 + $0x285]] }
  0xb3   : > { %v1404_v35 = vpop.eup %1403  ;;  %v630_v36 = vadd.f32 %v628_v22, %v624_v27  ;;  %v640_v38 = vmul.f32 %v1927_v30, %v639_v33  ;;  %v641_v39 = vmul.f32 %v1938_v37, %v639_v33  ;;  %v661_v40 = vstv %s2051_s23  ;;  %s2123_s10 = sld [smem:[#allocation7 + $0x305]] }
  0xb4   : > { %v1406_v41 = vpop.eup %1405  ;;  %v530_v42 = vadd.f32 1.0, %v1404_v35  ;;  %v631_v43 = vadd.f32 %v629_v26, %v625_v32  ;;  %v662_v44 = vmul.f32 %v661_v40, %v1859_v0  ;;  %v663_v45 = vmul.f32 %v661_v40, %v1862_v1  ;;  %s2132_s23 = sld [smem:[#allocation7 + $0x385]] }
  0xb5   : > { %v531_v46 = vadd.f32 1.0, %v1406_v41  ;;  %v636_v47 = vadd.f32 %v634_v31, %v630_v36  ;;  %v665_v48 = vstv %s2055_s20  ;;  %v671_v49 = vstv %s2057_s21  ;;  %s2150_s20 = sld [smem:[#allocation8 + $0x5]] }
  0xb6   : > { %1415 = vrcp.f32 %v530_v42  ;;  %v637_v50 = vadd.f32 %v635_v23, %v631_v43  ;;  %v666_v51 = vmul.f32 %v1867_v2, %v665_v48  ;;  %v667_v52 = vmul.f32 %v1870_v3, %v665_v48  ;;  %s2158_s21 = sld [smem:[#allocation10]] }
  0xb7   : > { %1417 = vrcp.f32 %v531_v46  ;;  %v642_v53 = vadd.f32 %v640_v38, %v636_v47  ;;  %v672_v54 = vmul.f32 %v1875_v4, %v671_v49  ;;  %v673_v55 = vmul.f32 %v1878_v5, %v671_v49 }
  0xb8   : > { %v643_v56 = vadd.f32 %v641_v39, %v637_v50  ;;  %v668_v57 = vadd.f32 %v666_v51, %v662_v44  ;;  %v669_v58 = vadd.f32 %v667_v52, %v663_v45  ;;  %v677_v59 = vstv %s2066_s19  ;;  %s2161_s19 = sld [smem:[#allocation10 + $0x80]] }
  0xb9   : > { %v2098_v60 = vpop.eup %1407  ;;  %v646_v61 = vadd.f32 %v645_v34, %v642_v53  ;;  %v678_v62 = vmul.f32 %v1883_v7, %v677_v59  ;;  %v679_v63 = vmul.f32 %v1886_v8, %v677_v59  ;;  %v683_v6 = vstv %s2070_s24  ;;  %s2163_s24 = sld [smem:[#allocation10 + $0x1]] }
  0xba   : > { %v2105_v9 = vpop.eup %1409  ;;  %v647_v10 = vadd.f32 %v645_v34, %v643_v56  ;;  %v674_v11 = vadd.f32 %v672_v54, %v668_v57  ;;  %v675_v12 = vadd.f32 %v673_v55, %v669_v58  ;;  %v684_v13 = vmul.f32 %v1897_v15, %v683_v6 }
  0xbb   : > { %v1224_v14 = vmul.f32 -1.442695, %v646_v61  ;;  %v685_v17 = vmul.f32 %v1900_v16, %v683_v6  ;;  %v689_v18 = vstv %s2074_s25  ;;  %v695_v19 = vstv %s2079_s22  ;;  %s2166_s25 = sld [smem:[#allocation10 + $0x81]] }
  0xbc   : > { %v1225_v20 = vmul.f32 -1.442695, %v647_v10  ;;  %v680_v21 = vadd.f32 %v678_v62, %v674_v11  ;;  %v681_v22 = vadd.f32 %v679_v63, %v675_v12  ;;  %v690_v26 = vmul.f32 %v1911_v24, %v689_v18  ;;  %s2168_s22 = sld [smem:[#allocation10 + $0x100]] }
  0xbd   : > { %1419 = vpow2.f32 %v1224_v14  ;;  %v691_v27 = vmul.f32 %v1914_v25, %v689_v18  ;;  %v696_v31 = vmul.f32 %v1921_v28, %v695_v19  ;;  %v697_v34 = vmul.f32 %v1924_v29, %v695_v19 }
  0xbe   : > { %v1412_v23 = vpop.eup %1411  ;;  %v686_v32 = vadd.f32 %v684_v13, %v680_v21  ;;  %v687_v33 = vadd.f32 %v685_v17, %v681_v22  ;;  %v701_v35 = vstv %s2085_s9  ;;  %1421 = vpow2.f32 %v1225_v20  ;;  %s2170_s9 = sld [smem:[#allocation10 + $0x101]] }
  0xbf   : > { %v1414_v36 = vpop.eup %1413  ;;  %v592_v38 = vadd.f32 1.0, %v1412_v23  ;;  %v702_v39 = vmul.f32 %v1927_v30, %v701_v35  ;;  %v703_v42 = vmul.f32 %v1938_v37, %v701_v35  ;;  %v723_v43 = vstv %s2093_s2  ;;  %s2174_s2 = sld [smem:[#allocation10 + $0x82]] }
  0xc0   : > { %v692_v40 = vadd.f32 %v690_v26, %v686_v32  ;;  %v693_v41 = vadd.f32 %v691_v27, %v687_v33  ;;  %v707_v44 = vstv %s2089_s17  ;;  %v724_v45 = vmul.f32 %v723_v43, %v1859_v0  ;;  %s2172_s17 = sld [smem:[#allocation10 + $0x2]] }
  0xc1   : > { %v725_v46 = vmul.f32 %v723_v43, %v1862_v1  ;;  %v727_v47 = vstv %s2096_s18  ;;  %v593_v48 = vadd.f32 1.0, %v1414_v36  ;;  %v733_v54 = vstv %s2103_s30  ;;  %s2177_s18 = sld [smem:[#allocation10 + $0x180]] }
  0xc2   : > { %v698_v49 = vadd.f32 %v696_v31, %v692_v40  ;;  %v699_v50 = vadd.f32 %v697_v34, %v693_v41  ;;  %v728_v51 = vmul.f32 %v1867_v2, %v727_v47  ;;  %v729_v53 = vmul.f32 %v1870_v3, %v727_v47  ;;  %s2182_s30 = sld [smem:[#allocation10 + $0x102]] }
  0xc3   : > { %v2134_v52 = vpop.eup %1415  ;;  %v739_v55 = vstv %s2108_s12  ;;  %v745_v56 = vstv %s2113_s13  ;;  %v734_v59 = vmul.f32 %v1875_v4, %v733_v54  ;;  %v735_v2 = vmul.f32 %v1878_v5, %v733_v54  ;;  %s2186_s12 = sld [smem:[#allocation10 + $0x3]] }
  0xc4   : > { %v2140_v57 = vpop.eup %1417  ;;  %v704_v0 = vadd.f32 %v702_v39, %v698_v49  ;;  %v705_v1 = vadd.f32 %v703_v42, %v699_v50  ;;  %v730_v58 = vadd.f32 %v728_v51, %v724_v45  ;;  %v731_v61 = vadd.f32 %v729_v53, %v725_v46  ;;  %s2190_s13 = sld [smem:[#allocation10 + $0x83]] }
  0xc5   : > { %v740_v62 = vmul.f32 %v1883_v7, %v739_v55  ;;  %v741_v63 = vmul.f32 %v1886_v8, %v739_v55  ;;  %v746_v11 = vmul.f32 %v1897_v15, %v745_v56  ;;  %v747_v13 = vmul.f32 %v1900_v16, %v745_v56 }
  0xc6   : > { %v708_v3 = vadd.f32 %v707_v44, %v704_v0  ;;  %v709_v6 = vadd.f32 %v707_v44, %v705_v1  ;;  %v736_v10 = vadd.f32 %v734_v59, %v730_v58  ;;  %v737_v12 = vadd.f32 %v735_v2, %v731_v61 }
  0xc7   : > { %v751_v14 = vstv %s2120_s16  ;;  %v757_v17 = vstv %s2123_s10  ;;  %1423 = vrcp.f32 %v592_v38  ;;  %v763_v16 = vstv %s2132_s23  ;;  %s2197_s16 = sld [smem:[#allocation10 + $0x181]] }
  0xc8   : > { %v1235_v4 = vmul.f32 -1.442695, %v708_v3  ;;  %v1236_v18 = vmul.f32 -1.442695, %v709_v6  ;;  %v742_v5 = vadd.f32 %v740_v62, %v736_v10  ;;  %v752_v7 = vmul.f32 %v1911_v24, %v751_v14  ;;  %s2201_s10 = sld [smem:[#allocation10 + $0x103]] }
  0xc9   : > { %v743_v8 = vadd.f32 %v741_v63, %v737_v12  ;;  %v753_v19 = vmul.f32 %v1914_v25, %v751_v14  ;;  %v758_v21 = vmul.f32 %v1921_v28, %v757_v17  ;;  %v759_v26 = vmul.f32 %v1924_v29, %v757_v17  ;;  %s2206_s23 = sld [smem:[#allocation10 + $0x200]] }
  0xca   : > { %v1420_v20 = vpop.eup %1419  ;;  %1425 = vpow2.f32 %v1235_v4  ;;  %v748_v15 = vadd.f32 %v746_v11, %v742_v5  ;;  %v764_v24 = vmul.f32 %v1927_v30, %v763_v16  ;;  %v765_v25 = vmul.f32 %v1938_v37, %v763_v16 }
  0xcb   : > { %1427 = vpow2.f32 %v1236_v18  ;;  %v749_v22 = vadd.f32 %v747_v13, %v743_v8  ;;  %v1422_v27 = vpop.eup %1421  ;;  %v769_v33 = vstv %s2150_s20  ;;  %v654_v34 = vadd.f32 1.0, %v1420_v20  ;;  %s2211_s20 = sld [smem:[#allocation10 + $0x182]] }
  0xcc   : > { %1429 = vrcp.f32 %v593_v48  ;;  %v754_v31 = vadd.f32 %v752_v7, %v748_v15  ;;  %v655_v36 = vadd.f32 1.0, %v1422_v27  ;;  %v785_v40 = vstv %s2158_s21  ;;  %s2216_s21 = sld [smem:[#allocation10 + $0x183]] }
  0xcd   : > { %v755_v23 = vadd.f32 %v753_v19, %v749_v22  ;;  %1431 = vrcp.f32 %v654_v34  ;;  %v789_v42 = vstv %s2161_s19  ;;  %v835_v44 = vstv %s2163_s24  ;;  %s2218_s19 = sld [smem:[#allocation10 + $0x280]] }
  0xce   : > { %v760_v32 = vadd.f32 %v758_v21, %v754_v31  ;;  %v839_v45 = vstv %s2166_s25  ;;  %v786_v47 = vmul.f32 %v2098_v60, %v785_v40  ;;  %v787_v48 = vmul.f32 %v2105_v9, %v785_v40  ;;  %s2223_s24 = sld [smem:[#allocation11]] }
  0xcf   : > { %v761_v28 = vadd.f32 %v759_v26, %v755_v23  ;;  %v790_v51 = vmul.f32 %v2134_v52, %v789_v42  ;;  %v791_v53 = vmul.f32 %v2140_v57, %v789_v42  ;;  %v795_v54 = vstv %s2168_s22  ;;  %s2229_s25 = sld [smem:[#allocation10 + $0x201]] }
  0xd0   : > { %v766_v29 = vadd.f32 %v764_v24, %v760_v32  ;;  %v836_v55 = vmul.f32 %v2098_v60, %v835_v44  ;;  %v840_v56 = vmul.f32 %v2134_v52, %v839_v45  ;;  %v845_v1 = vstv %s2170_s9  ;;  %s2234_s22 = sld [smem:[#allocation10 + $0x202]] }
  0xd1   : > { %v767_v35 = vadd.f32 %v765_v25, %v761_v28  ;;  %v885_v61 = vstv %s2172_s17  ;;  %v889_v2 = vstv %s2174_s2  ;;  %v792_v62 = vadd.f32 %v790_v51, %v786_v47  ;;  %s2241_s9 = sld [smem:[#allocation10 + $0x203]] }
  0xd2   : > { %v770_v30 = vadd.f32 %v769_v33, %v766_v29  ;;  %v793_v63 = vadd.f32 %v791_v53, %v787_v48  ;;  %v801_v3 = vstv %s2177_s18  ;;  %v837_v6 = vmul.f32 %v2105_v9, %v835_v44  ;;  %s2243_s17 = sld [smem:[#allocation10 + $0x281]] }
  0xd3   : > { %v771_v37 = vadd.f32 %v769_v33, %v767_v35  ;;  %v841_v10 = vmul.f32 %v2140_v57, %v839_v45  ;;  %v842_v11 = vadd.f32 %v840_v56, %v836_v55  ;;  %v886_v13 = vmul.f32 %v2098_v60, %v885_v61  ;;  %s2246_s2 = sld [smem:[#allocation11 + $0x1]] }
  0xd4   : > { %v1246_v38 = vmul.f32 -1.442695, %v770_v30  ;;  %v2179_v41 = vpop.eup %1423  ;;  %v887_v14 = vmul.f32 %v2105_v9, %v885_v61  ;;  %v890_v17 = vmul.f32 %v2134_v52, %v889_v2  ;;  %v891_v4 = vmul.f32 %v2140_v57, %v889_v2  ;;  %s2250_s18 = sld [smem:[#allocation10 + $0x282]] }
  0xd5   : > { %v1247_v39 = vmul.f32 -1.442695, %v771_v37  ;;  %v796_v58 = vmul.f32 %v2179_v41, %v795_v54  ;;  %v846_v12 = vmul.f32 %v2179_v41, %v845_v1  ;;  %v895_v18 = vstv %s2182_s30  ;;  %s2254_s30 = sld [smem:[#allocation11 + $0x2]] }
  0xd6   : > { %1433 = vpow2.f32 %v1246_v38  ;;  %v935_v5 = vstv %s2186_s12  ;;  %v939_v7 = vstv %s2190_s13  ;;  %v851_v16 = vstv %s2197_s16  ;;  %s2256_s12 = sld [smem:[#allocation10 + $0x283]] }
  0xd7   : > { %v1426_v43 = vpop.eup %1425  ;;  %1435 = vpow2.f32 %v1247_v39  ;;  %v798_v8 = vadd.f32 %v796_v58, %v792_v62  ;;  %v936_v20 = vmul.f32 %v2098_v60, %v935_v5  ;;  %v940_v15 = vmul.f32 %v2134_v52, %v939_v7  ;;  %s2258_s13 = sld [smem:[#allocation11 + $0x3]] }
  0xd8   : > { %v1428_v46 = vpop.eup %1427  ;;  %1437 = vrcp.f32 %v655_v36  ;;  %v716_v50 = vadd.f32 1.0, %v1426_v43  ;;  %v937_v22 = vmul.f32 %v2105_v9, %v935_v5  ;;  %v941_v26 = vmul.f32 %v2140_v57, %v939_v7  ;;  %s984_s16 = sld [smem:[#allocation13]] }
  0xd9   : > { %v2192_v49 = vpop.eup %1429  ;;  %v717_v0 = vadd.f32 1.0, %v1428_v46  ;;  %v945_v27 = vstv %s2201_s10  ;;  %v843_v24 = vadd.f32 %v841_v10, %v837_v6  ;;  %v848_v25 = vadd.f32 %v846_v12, %v842_v11  ;;  %s1282_s10 = sld [smem:[#allocation13 + $0x80]] }
  0xda   : > { %v797_v59 = vmul.f32 %v2192_v49, %v795_v54  ;;  %1439 = vrcp.f32 %v716_v50  ;;  %v1432_v21 = vpop.eup %1431  ;;  %v847_v23 = vmul.f32 %v2192_v49, %v845_v1  ;;  %v896_v32 = vmul.f32 %v2179_v41, %v895_v18 }
  0xdb   : > { %1441 = vrcp.f32 %v717_v0  ;;  %v892_v28 = vadd.f32 %v890_v17, %v886_v13  ;;  %v893_v9 = vadd.f32 %v891_v4, %v887_v14  ;;  %v897_v57 = vmul.f32 %v2192_v49, %v895_v18 }
  0xdc   : > { %v799_v19 = vadd.f32 %v797_v59, %v793_v63  ;;  %v901_v34 = vstv %s2211_s20  ;;  %v942_v35 = vadd.f32 %v940_v15, %v936_v20  ;;  %v946_v30 = vmul.f32 %v2179_v41, %v945_v27  ;;  %s1284_s20 = sld [smem:[#allocation13 + $0x180]] }
  0xdd   : > { %v943_v37 = vadd.f32 %v941_v26, %v937_v22  ;;  %v947_v36 = vmul.f32 %v2192_v49, %v945_v27  ;;  %v951_v38 = vstv %s2216_s21  ;;  %v802_v39 = vmul.f32 %v1432_v21, %v801_v3  ;;  %s2272_s21 = sld [smem:[#allocation2]] }
  0xde   : > { %v849_v40 = vadd.f32 %v847_v23, %v843_v24  ;;  %v852_v42 = vmul.f32 %v1432_v21, %v851_v16  ;;  %v898_v41 = vadd.f32 %v896_v32, %v892_v28  ;;  %v902_v45 = vmul.f32 %v1432_v21, %v901_v34 }
  0xdf   : > { %v899_v46 = vadd.f32 %v897_v57, %v893_v9  ;;  %v948_v48 = vadd.f32 %v946_v30, %v942_v35  ;;  %v952_v49 = vmul.f32 %v1432_v21, %v951_v38  ;;  %v807_v51 = vstv %s2206_s23  ;;  %s1283_s23 = sld [smem:[#allocation13 + $0x100]] }
  0xe0   : > { %v949_v53 = vadd.f32 %v947_v36, %v943_v37  ;;  %v857_v55 = vstv %s2229_s25  ;;  %v907_v56 = vstv %s2234_s22  ;;  %v957_v0 = vstv %s2241_s9 }
  0xe1   : > { %v804_v58 = vadd.f32 %v802_v39, %v798_v8  ;;  %v854_v61 = vadd.f32 %v852_v42, %v848_v25  ;;  %v904_v63 = vadd.f32 %v902_v45, %v898_v41  ;;  %v954_v6 = vadd.f32 %v952_v49, %v948_v48 }
  0xe2   : > { %v813_v5 = vstv %s2218_s19  ;;  %v819_v7 = vstv %s2223_s24  ;;  %v863_v8 = vstv %s2243_s17  ;;  %v913_v20 = vstv %s2250_s18  ;;  %s1169_s19 = sshll.u32 %s1836_s1, 4  ;;  %s1291_s24 = sshll.u32 %s1710_s6, 8 }
  0xe3   : > { %v1434_v31 = vpop.eup %1433  ;;  %v919_v15 = vstv %s2254_s30  ;;  %v963_v21 = vstv %s2256_s12  ;;  %s386_s25 = scalar_lea.vmem [#allocation14], %s1169_s19  ;;  %s1013_s18 = scalar_lea.sflag [#allocation5], %s1836_s1 }
  0xe4   : > { %v1436_v60 = vpop.eup %1435  ;;  %v778_v52 = vadd.f32 1.0, %v1434_v31  ;;  %s1026_s22 = sshll.u32 %s386_s25, 4  ;;  %s1643_s30 = smov [#allocation14]   ;;  %s2282_s22 = int_to_ptr.vmem [resolvable:$true] %s1026_s22 }
  0xe5   : > { %v1438_v33 = vpop.eup %1437  ;;  %v779_v29 = vadd.f32 1.0, %v1436_v60  ;;  %s1554_s6 = scalar_lea.vmem %s2282_s22, 256  ;;  %s1558_s12 = sshll.u32 %s1643_s30, 4  ;;  %s1559_s12 = int_to_ptr.vmem [resolvable:$false] %s1558_s12 }
  0xe6   : > { %1443 = vrcp.f32 %v778_v52  ;;  %v803_v43 = vmul.f32 %v1438_v33, %v801_v3  ;;  %v853_v44 = vmul.f32 %v1438_v33, %v851_v16  ;;  %v903_v47 = vmul.f32 %v1438_v33, %v901_v34  ;;  %p1555_p10 = scmp.ne.s32.totalorder %s2282_s22, %s1554_s6  ;;  %p1561_p0 = scmp.lt.s32.totalorder %s2282_s22, %s1559_s12 }
  0xe7   : > { %1445 = vrcp.f32 %v779_v29  ;;  %v1440_v50 = vpop.eup %1439  ;;  %v953_v54 = vmul.f32 %v1438_v33, %v951_v38  ;;  %v969_v16 = vstv %s2258_s13  ;;  %s1560_s13 = scalar_lea.vmem %s1559_s12, 512 }
  0xe8   : > { %v1442_v1 = vpop.eup %1441  ;;  %v805_v59 = vadd.f32 %v803_v43, %v799_v19  ;;  %v855_v2 = vadd.f32 %v853_v44, %v849_v40  ;;  %v808_v62 = vmul.f32 %v1440_v50, %v807_v51  ;;  %v905_v3 = vadd.f32 %v903_v47, %v899_v46  ;;  %p1556_p6 = pnand %p1555_p10, %p2358_p5  ;;  %p1562_p3 = scmp.lt.s32.totalorder %s1560_s13, %s1554_s6 }
  0xe9   : > { %v858_v10 = vmul.f32 %v1440_v50, %v857_v55  ;;  %v908_v11 = vmul.f32 %v1440_v50, %v907_v56  ;;  %v955_v12 = vadd.f32 %v953_v54, %v949_v53  ;;  %v958_v13 = vmul.f32 %v1440_v50, %v957_v0 }
  0xea   : > { %v809_v14 = vmul.f32 %v1442_v1, %v807_v51  ;;  %v859_v17 = vmul.f32 %v1442_v1, %v857_v55  ;;  %v909_v4 = vmul.f32 %v1442_v1, %v907_v56  ;;  %v959_v18 = vmul.f32 %v1442_v1, %v957_v0  ;;  %p1557_p13 = pneg %p1556_p6  ;;  %p1563_p2 = por %p1562_p3, %p1561_p0 }
  0xeb   : > { %v869_v19 = vstv %s2246_s2  ;;  %v810_v22 = vadd.f32 %v808_v62, %v804_v58  ;;  %v860_v26 = vadd.f32 %v858_v10, %v854_v61  ;;  %v910_v27 = vadd.f32 %v908_v11, %v904_v63  ;;  %s2280_s2 = scalar_lea.hbm %s2332_s7, %s1291_s24 }
  0xec   : > { %v960_v31 = vadd.f32 %v958_v13, %v954_v6  ;;  %v811_v23 = vadd.f32 %v809_v14, %v805_v59  ;;  %v861_v25 = vadd.f32 %v859_v17, %v855_v2  ;;  %v911_v32 = vadd.f32 %v909_v4, %v905_v3  ;;  %p1564_p7 = pnand %p1563_p2, %p1557_p13 }
  0xed   : > { %v961_v60 = vadd.f32 %v959_v18, %v955_v12 }
  0xf3   : > { %v1444_v24 = vpop.eup %1443 }
  0xf4   : > { %v1446_v52 = vpop.eup %1445  ;;  %v814_v28 = vmul.f32 %v1444_v24, %v813_v5  ;;  %v864_v9 = vmul.f32 %v1444_v24, %v863_v8  ;;  %v914_v57 = vmul.f32 %v1444_v24, %v913_v20  ;;  %v964_v33 = vmul.f32 %v1444_v24, %v963_v21 }
  0xf5   : > { %v815_v29 = vmul.f32 %v1446_v52, %v813_v5  ;;  %v865_v34 = vmul.f32 %v1446_v52, %v863_v8  ;;  %v915_v35 = vmul.f32 %v1446_v52, %v913_v20  ;;  %v965_v30 = vmul.f32 %v1446_v52, %v963_v21 }
  0xf6   : > { %v816_v37 = vadd.f32 %v814_v28, %v810_v22  ;;  %v866_v36 = vadd.f32 %v864_v9, %v860_v26  ;;  %v916_v38 = vadd.f32 %v914_v57, %v910_v27  ;;  %v966_v39 = vadd.f32 %v964_v33, %v960_v31 }
  0xf7   : > { %v817_v40 = vadd.f32 %v815_v29, %v811_v23  ;;  %v867_v42 = vadd.f32 %v865_v34, %v861_v25  ;;  %v917_v43 = vadd.f32 %v915_v35, %v911_v32  ;;  %v967_v44 = vadd.f32 %v965_v30, %v961_v60 }
  0xf8   : > { %v820_v41 = vadd.f32 %v819_v7, %v816_v37  ;;  %v870_v45 = vadd.f32 %v869_v19, %v866_v36  ;;  %v920_v46 = vadd.f32 %v919_v15, %v916_v38  ;;  %v970_v53 = vadd.f32 %v969_v16, %v966_v39 }
  0xf9   : > { %v821_v47 = vadd.f32 %v819_v7, %v817_v40  ;;  %v871_v48 = vadd.f32 %v869_v19, %v867_v42  ;;  %v921_v49 = vadd.f32 %v919_v15, %v917_v43  ;;  %v971_v56 = vadd.f32 %v969_v16, %v967_v44 }
  0xfa   : > { %v1253_v50 = vmul.f32 -1.442695, %v820_v41  ;;  %v1262_v51 = vmul.f32 -1.442695, %v870_v45  ;;  %v1271_v0 = vmul.f32 -1.442695, %v920_v46  ;;  %v985_v8 = vstv %s984_s16 }
  0xfb   : > { %v1254_v54 = vmul.f32 -1.442695, %v821_v47  ;;  %v1263_v55 = vmul.f32 -1.442695, %v871_v48  ;;  %v1272_v1 = vmul.f32 -1.442695, %v921_v49  ;;  %v989_v20 = vstv %s1282_s10 }
  0xfc   : > { %1447 = vpow2.f32 %v1253_v50  ;;  %v1280_v58 = vmul.f32 -1.442695, %v970_v53  ;;  %v1281_v59 = vmul.f32 -1.442695, %v971_v56  ;;  %v995_v26 = vstv %s1283_s23 }
  0xfd   : > { %1449 = vpow2.f32 %v1254_v54  ;;  %v1001_v25 = vstv %s1284_s20  ;;  %v1007_v37 = vstv %s2272_s21 }
  0xfe   : > { %1451 = vpow2.f32 %v1262_v51 }
  0xff   : > { %1453 = vpow2.f32 %v1263_v55 }
 0x100   : > { %1455 = vpow2.f32 %v1271_v0 }
 0x101   : > { %1457 = vpow2.f32 %v1272_v1 }
 0x102   : > { %1459 = vpow2.f32 %v1280_v58 }
 0x103   : > { %1461 = vpow2.f32 %v1281_v59 }
 0x109   : > { %v1448_v61 = vpop.eup %1447 }
 0x10a   : > { %v1450_v2 = vpop.eup %1449  ;;  %v828_v62 = vadd.f32 1.0, %v1448_v61 }
 0x10b   : > { %v1452_v63 = vpop.eup %1451  ;;  %v829_v3 = vadd.f32 1.0, %v1450_v2 }
 0x10c   : > { %v1454_v6 = vpop.eup %1453  ;;  %1463 = vrcp.f32 %v828_v62  ;;  %v878_v10 = vadd.f32 1.0, %v1452_v63 }
 0x10d   : > { %v1456_v11 = vpop.eup %1455  ;;  %1465 = vrcp.f32 %v829_v3  ;;  %v879_v12 = vadd.f32 1.0, %v1454_v6 }
 0x10e   : > { %v1458_v13 = vpop.eup %1457  ;;  %1467 = vrcp.f32 %v878_v10  ;;  %v928_v14 = vadd.f32 1.0, %v1456_v11 }
 0x10f   : > { %v1460_v17 = vpop.eup %1459  ;;  %1469 = vrcp.f32 %v879_v12  ;;  %v929_v4 = vadd.f32 1.0, %v1458_v13 }
 0x110   : > { %v1462_v18 = vpop.eup %1461  ;;  %1471 = vrcp.f32 %v928_v14  ;;  %v978_v5 = vadd.f32 1.0, %v1460_v17 }
 0x111   : > { %1473 = vrcp.f32 %v929_v4  ;;  %v979_v7 = vadd.f32 1.0, %v1462_v18 }
 0x112   : > { %1475 = vrcp.f32 %v978_v5 }
 0x113   : > { %1477 = vrcp.f32 %v979_v7 }
 0x119   : > { %v1464_v19 = vpop.eup %1463 }
 0x11a   : > { %v1466_v15 = vpop.eup %1465  ;;  %v986_v21 = vmul.f32 %v1464_v19, %v985_v8 }
 0x11b   : > { %v1468_v16 = vpop.eup %1467  ;;  %v987_v22 = vmul.f32 %v1466_v15, %v985_v8 }
 0x11c   : > { %v1470_v27 = vpop.eup %1469  ;;  %v990_v31 = vmul.f32 %v1468_v16, %v989_v20 }
 0x11d   : > { %v1472_v24 = vpop.eup %1471  ;;  %v991_v23 = vmul.f32 %v1470_v27, %v989_v20 }
 0x11e   : > { %v1474_v32 = vpop.eup %1473  ;;  %v992_v60 = vadd.f32 %v990_v31, %v986_v21  ;;  %v996_v52 = vmul.f32 %v1472_v24, %v995_v26 }
 0x11f   : > { %v1476_v28 = vpop.eup %1475  ;;  %v993_v9 = vadd.f32 %v991_v23, %v987_v22  ;;  %v997_v57 = vmul.f32 %v1474_v32, %v995_v26 }
 0x120   : > { %v1478_v33 = vpop.eup %1477  ;;  %v998_v29 = vadd.f32 %v996_v52, %v992_v60  ;;  %v1002_v34 = vmul.f32 %v1476_v28, %v1001_v25 }
 0x121   : > { %v999_v35 = vadd.f32 %v997_v57, %v993_v9  ;;  %v1003_v30 = vmul.f32 %v1478_v33, %v1001_v25 }
 0x122   : > { %v1004_v36 = vadd.f32 %v1002_v34, %v998_v29 }
 0x123   : > { %v1005_v38 = vadd.f32 %v1003_v30, %v999_v35 }
 0x124   : > { %v1008_v39 = vadd.f32 %v1007_v37, %v1004_v36 }
 0x125   : > { %v1009_v40 = vadd.f32 %v1007_v37, %v1005_v38 }
 0x126   : > { %1010 = vst [vmem:[%s386_s25] sm:$0xff] %v1008_v39 }
 0x127   : > { %1011 = vst [vmem:[%s386_s25 + $0x8] sm:$0xff] %v1009_v40 }
 0x128   : > { %1567 = shalt.err (!%p1564_p7)
}
 0x129   : > { %s1568_s16 = scalar_lea.hbm %s2280_s2, 256  ;;  %s1572_s20 = scalar_lea.hbm %s2332_s7, 512 }
 0x12a   : > { %p1569_p4 = scmp.ne.s32.totalorder %s2280_s2, %s1568_s16  ;;  %p1573_p11 = scmp.lt.s32.totalorder %s2280_s2, %s2332_s7 }
 0x12b   : > { %p1574_p12 = scmp.lt.s32.totalorder %s1572_s20, %s1568_s16 }
 0x12c   : > { %p1570_p8 = pnand %p1569_p4, %p2358_p5 }
 0x12d   : > { %p1575_p10 = por %p1574_p12, %p1573_p11 }
 0x12e   : > { %p1571_p9 = pneg %p1570_p8 }
 0x130   : > { %p1576_p6 = pnand %p1575_p10, %p1571_p9 }
 0x132   : > { %1579 = shalt.err (!%p1576_p6)
}
 0x133   : > { %s1644_s24 = smov 128   ;;  %s1645_s25 = smov 8  }
 0x134   : > { %1321 = dma.vmem_to_hbm [thread:$0]  (%p2358_p5), %s2282_s22, 256, %s2280_s2, %s1013_s18, %s1644_s24, %s1644_s24, %s1645_s25  }
 0x135 PF: > { %s1041_s9 = sand.u32 1, %s1618_s26   ;;  %p2359_p13 = scmp.ne.s32.totalorder %s2343_s15, 0 }
 0x136   : > { %s1042_s17 = scalar_lea.sflag [#allocation5], %s1041_s9 }
 0x137   : > { %p1340_p0 = pnand %p1156_p1, %p2359_p13 }
 0x139   : > { %p1341_p3 = pneg %p1340_p0 }
 0x13b   : > { %1613 = dma.done.wait (%p1341_p3), %s1042_s17, 256  }
 0x13c   : > { %1615 = vsyncadd (%p1341_p3), %s1042_s17, 4294967040  ;;  %p24_p2 = scmp.ge.s32.totalorder %s1714_s8, 4   ;;  %s2360_s26 = smov %s1622_s27 }
 0x13d   : > { %s2361_s27 = smov %s1626_s28  ;;  %s2362_s28 = smov %s1726_s11 }
 0x13e   : > { %s2363_s29 = smov %s1714_s8  ;;  %26 = sbr.rel (!%p24_p2) target bundleno = 12 (0xc), region = 126 }
 0x143   :  { %1047 = vsyncpa [#allocation4], 1 }
 0x144   :  { %1049 = vsyncpa [#allocation4 + $0x1], 1 }
 0x145   :  { %1050 = vsyncpa [#allocation5], 1 }
 0x146   :  { %1052 = vsyncpa [#allocation5 + $0x1], 1 }
 0x147   :  { %1053 = vsyncpa [#allocation6], 1 }
 0x148   :  { %1055 = vsyncpa [#allocation6 + $0x1], 1 }
 0x149   :  { %1056 = vsyncpa [#allocation9], 1 }
 0x14a   :  { %1057 = vsyncpa [#allocation12], 1 }

</bundles_post_ra>
